<compile_context>
chip_gen: v7x
topology: tpu7x:2x2x1
jax: 0.10.0
libtpu: 0.0.40
codegen_flags: <defaults>
</compile_context>

<pallas_src>
import jax
import jax.numpy as jnp
from jax.experimental import pallas as pl
from jax.experimental.pallas import tpu as pltpu


# Below this, fused XLA elementwise wins (launch overhead + lost producer fusion).
_MIN_PALLAS_ELEMS = 256 * 1024
# ~8 MiB full-width row blocks.
_TARGET_BLOCK_BYTES = 8 << 20
# Headroom for Mosaic internal scratch on top of the pipelined buffers.
_VMEM_HEADROOM_BYTES = 8 << 20
# Above this total size, force the grid to have >= _MIN_GRID steps so the DMA
# pipeline overlaps and v7x's second TensorCore is not idle.
_MIN_SPLIT_BYTES = 1 << 20
_MIN_GRID = 4


def _sublane_multiple(itemsize: int) -> int:
    # f32 -> 8, bf16/fp16 -> 16, int8/fp8 -> 32 (sublane packing).
    return {4: 8, 2: 16, 1: 32}.get(itemsize, 8)


def _sine_kernel(omega_ref, x_ref, o_ref):
    omega = omega_ref[0]  # f32 scalar from SMEM (free: scalar slot has slack)
    # Compute in f32 regardless of input dtype: avoids bf16 phase error in
    # omega*x, and the upcast is free while the kernel is HBM-bound.
    # TODO(synk): if the bundle shows the bf16 path is VALU-bound on v6e/v7x
    # (sin range-reduction + polynomial vs. the bf16 HBM roofline), consider a
    # cheaper bf16 polynomial there; keep f32 on v5e (no bf16 VPU).
    x = x_ref[...].astype(jnp.float32)
    o_ref[...] = jnp.sin(omega * x).astype(o_ref.dtype)


def _sine_xla(x: jax.Array, omega) -> jax.Array:
    om = jnp.asarray(omega, dtype=jnp.float32)
    return jnp.sin(om * x.astype(jnp.float32)).astype(x.dtype)


def sine(x: jax.Array, omega: float = 30.0, *,
         min_pallas_elems: int = _MIN_PALLAS_ELEMS) -> jax.Array:
    """y = sin(omega * x), elementwise, via a lane-dense row-tiled Pallas kernel."""
    orig_shape = x.shape
    orig_dtype = x.dtype
    n = int(x.size)
    if n == 0:
        return x
    # Small tensors: fused XLA beats a standalone kernel (and keeps fusion with
    # the producing op in a SIREN layer).
    if n < min_pallas_elems:
        return _sine_xla(x, omega)

    itemsize = jnp.dtype(orig_dtype).itemsize
    sublane = _sublane_multiple(itemsize)

    # Pick a lane-dense width (multiple of 128) when the element count allows:
    # unmasked full-lane stores, contiguous HBM transfers.
    cols = None
    for cand in (2048, 1024, 512, 256, 128):
        if n % cand == 0:
            cols = cand
            break

    if cols is not None:
        x2 = x.reshape(n // cols, cols)          # free reshape (contiguous)
    elif x.ndim >= 2 and sublane * int(orig_shape[-1]) * itemsize <= _TARGET_BLOCK_BYTES:
        # Not a multiple of 128: use the original last dim as a full-extent
        # block width (legal; only edge lanes masked).  No pad/slice -> no
        # extra full-tensor HBM read+write.
        cols = int(orig_shape[-1])
        x2 = x.reshape(n // cols, cols)
    else:
        # Odd 1-D (or absurdly wide last dim) case: let fused XLA handle it.
        return _sine_xla(x, omega)

    rows = x2.shape[0]
    total_bytes = n * itemsize

    # Row-only tiling with full-width blocks of ~_TARGET_BLOCK_BYTES.
    tm = min(rows, max(sublane, _TARGET_BLOCK_BYTES // (cols * itemsize)))
    # Guarantee a minimum grid length for mid/large inputs so DMA overlaps and
    # both v7x TensorCores are used.
    if total_bytes >= _MIN_SPLIT_BYTES and rows >= _MIN_GRID * sublane:
        tm = min(tm, pl.cdiv(rows, _MIN_GRID))
    if tm < rows:
        tm = max(sublane, (tm // sublane) * sublane)  # keep (8,128)-legal blocks
    else:
        tm = rows                                      # full extent is always legal
    grid = (pl.cdiv(rows, tm),)

    # VMEM request from the actual footprint: 2 buffers x (in + out) + headroom.
    block_bytes = tm * cols * itemsize
    vmem_limit = int(min(max(4 * block_bytes + _VMEM_HEADROOM_BYTES, 16 << 20), 48 << 20))

    omega_arr = jnp.asarray(omega, dtype=jnp.float32).reshape((1,))

    out = pl.pallas_call(
        _sine_kernel,
        out_shape=jax.ShapeDtypeStruct((rows, cols), orig_dtype),
        grid_spec=pltpu.PrefetchScalarGridSpec(
            num_scalar_prefetch=0,
            grid=grid,
            in_specs=[
                pl.BlockSpec(memory_space=pltpu.MemorySpace.SMEM),  # omega scalar
                pl.BlockSpec((tm, cols), lambda i: (i, 0)),
            ],
            out_specs=pl.BlockSpec((tm, cols), lambda i: (i, 0)),
        ),
        compiler_params=pltpu.CompilerParams(
            dimension_semantics=("parallel",),
            vmem_limit_bytes=vmem_limit,
        ),
        cost_estimate=pl.CostEstimate(
            flops=2 * n,               # advisory only (sin polynomial not counted)
            transcendentals=n,
            bytes_accessed=2 * n * itemsize,
        ),
    )(omega_arr, x2)

    return out.reshape(orig_shape)


class Sine:
    """Pallas/JAX port of the PyTorch SIREN Sine module: forward(x) = sin(omega*x)."""

    def __init__(self, omega: float = 30.0, name: str = "sine"):
        self.omega = float(omega)
        self.name = name.lower()

    def __call__(self, x: jax.Array) -> jax.Array:
        return sine(x, self.omega)


if __name__ == "__main__":
    key = jax.random.PRNGKey(0)
    omega = 30.0
    k1, k2, k3, k4 = jax.random.split(key, 4)

    # 1) Lane-dense Pallas path (size divisible by 128 -> 2048-wide slab).
    #    min_pallas_elems=0 so the small demo shape exercises the kernel.
    x1 = jax.random.normal(k1, (64, 256), dtype=jnp.float32)
    y1 = jax.block_until_ready(sine(x1, omega, min_pallas_elems=0))
    assert y1.shape == x1.shape and y1.dtype == x1.dtype
    assert jnp.allclose(y1, jnp.sin(omega * x1), atol=1e-5, rtol=1e-5)

    # 2) bf16 input: kernel computes in f32 internally, casts back to bf16.
    x2 = jax.random.normal(k2, (32, 384), dtype=jnp.bfloat16)
    y2 = jax.block_until_ready(sine(x2, omega, min_pallas_elems=0))
    ref2 = jnp.sin(omega * x2.astype(jnp.float32)).astype(jnp.bfloat16)
    assert y2.shape == x2.shape and y2.dtype == x2.dtype
    assert jnp.allclose(y2.astype(jnp.float32), ref2.astype(jnp.float32),
                        atol=2e-2, rtol=2e-2)

    # 3) Size not divisible by 128: full-extent last-dim block (masked edge
    #    lanes) instead of pad+slice -> still a single pass over HBM.
    x3 = jax.random.normal(k3, (8, 33), dtype=jnp.float32)
    y3 = jax.block_until_ready(sine(x3, omega, min_pallas_elems=0))
    assert y3.shape == x3.shape and y3.dtype == x3.dtype
    assert jnp.allclose(y3, jnp.sin(omega * x3), atol=1e-5, rtol=1e-5)

    # 4) Tiny SIREN activation (batch=2, hidden=32): below the default Pallas
    #    threshold -> fused-XLA fallback path (module-level semantics identical).
    x4 = jax.random.normal(k4, (2, 32), dtype=jnp.float32)
    y4 = jax.block_until_ready(Sine(omega)(x4))
    assert jnp.allclose(y4, jnp.sin(omega * x4), atol=1e-5, rtol=1e-5)

    print("KERNEL_OK")
</pallas_src>

<mosaic_0001>
module attributes {stable_mosaic.version = 11 : i64} {
  func.func @_sine_kernel(%arg0: i32, %arg1: memref<1xf32, #tpu.memory_space<smem>>, %arg2: memref<8x2048xf32, #tpu.memory_space<vmem>>, %arg3: memref<8x2048xf32, #tpu.memory_space<vmem>>) attributes {dimension_semantics = [#tpu.dimension_semantics<parallel>], iteration_bounds = array<i64: 1>, scalar_prefetch = 0 : i64, scratch_operands = 0 : i64, tpu.core_type = #tpu.core_type<tc>, window_params = [{transform_indices = @transform_0, window_bounds = array<i64: 1>}, {transform_indices = @transform_1, window_bounds = array<i64: 8, 2048>}, {transform_indices = @transform_2, window_bounds = array<i64: 8, 2048>}]} {
    %c0 = arith.constant 0 : index
    %0 = memref.load %arg1[%c0] : memref<1xf32, #tpu.memory_space<smem>>
    %c0_0 = arith.constant 0 : index
    %c0_1 = arith.constant 0 : index
    %1 = vector.load %arg2[%c0_0, %c0_1] : memref<8x2048xf32, #tpu.memory_space<vmem>>, vector<8x2048xf32>
    %2 = vector.broadcast %0 : f32 to vector<8x2048xf32>
    %3 = arith.mulf %2, %1 : vector<8x2048xf32>
    %4 = math.sin %3 : vector<8x2048xf32>
    %c0_2 = arith.constant 0 : index
    %c0_3 = arith.constant 0 : index
    %5 = vector.load %arg3[%c0_2, %c0_3] : memref<8x2048xf32, #tpu.memory_space<vmem>>, vector<8x2048xf32>
    tpu.vector_store %arg3[%c0_2, %c0_3], %4 {strides = array<i32>} : memref<8x2048xf32, #tpu.memory_space<vmem>>, vector<8x2048xf32>,
    return
  }
  func.func @transform_0(%arg0: i32) -> i32 {
    %c0_i32 = arith.constant 0 : i32
    %c0_i32_0 = arith.constant 0 : i32
    return %c0_i32 : i32
  }
  func.func @transform_1(%arg0: i32) -> (i32, i32) {
    %c0_i32 = arith.constant 0 : i32
    %c0_i32_0 = arith.constant 0 : i32
    return %arg0, %c0_i32 : i32, i32
  }
  func.func @transform_2(%arg0: i32) -> (i32, i32) {
    %c0_i32 = arith.constant 0 : i32
    %c0_i32_0 = arith.constant 0 : i32
    return %arg0, %c0_i32 : i32, i32
  }
}

</mosaic_0001>

<bundles_post_ra>
// kernel: tpu_custom_call.1
= control target key start
LH: loop header
LB: loop body
LE: loop exit
PB: predicated region body
PF: predicated region fallthrough
CT: control target
= control target key end

     0   :  { %8 = vsyncpa [#allocation4], 0  ;;  %s3377_s0 = inlined_call_operand.<no memory space> [shape: f32[1], index: 0, kind: input, shape index: {}]   ;;  %s3378_s1 = inlined_call_operand.hbm [shape: f32[8,2048], index: 1, kind: input, shape index: {}]   ;;  %s3379_s2 = inlined_call_operand.hbm [shape: f32[8,2048], index: 2, kind: output, shape index: {}]  }
   0x1   :  { %9 = vsyncpa [#allocation5], 0  ;;  %s2002_s9 = smov [#allocation3]   ;;  %s1954_s13 = scalar_lea.hbm %s3378_s1, 2048 }
   0x2   :  { %s18_s10 = sshll.u32 %s2002_s9, 4  ;;  %p1955_p0 = scmp.ne.s32.totalorder %s3378_s1, %s1954_s13  ;;  %s19_s10 = int_to_ptr.vmem [resolvable:$true] %s18_s10 }
   0x3   :  { %p1958_p1 = scmp.lt.u32.totalorder %s1954_s13, %s3378_s1 }
   0x5   :  { %p1960_p2 = pnand %p1958_p1, %p1955_p0 }
   0x7   :  { %1963 = shalt.err (!%p1960_p2)
}
   0x8   :  { %s1964_s18 = scalar_lea.vmem %s19_s10, 2048  ;;  %p1969_p4 = scmp.lt.s32.totalorder %s19_s10, %s19_s10 }
   0x9   :  { %p1965_p3 = scmp.ne.s32.totalorder %s19_s10, %s1964_s18  ;;  %p1970_p5 = scmp.lt.s32.totalorder %s1964_s18, %s1964_s18 }
   0xb   :  { %p1971_p6 = por %p1970_p5, %p1969_p4 }
   0xd   :  { %p1972_p7 = pnand %p1971_p6, %p1965_p3 }
   0xf   :  { %1975 = shalt.err (!%p1972_p7)
}
  0x10   :  { %21 = dma.hbm_to_vmem [thread:$0]  %s3378_s1, 2048, %s19_s10, [#allocation4]  }
  0x11   :  { %1998 = dma.done.wait [#allocation4], 2048  }
  0x12   :  { %1999 = vsyncadd [#allocation4], 4294965248  ;;  %v2040_v0 = vstv %s3377_s0  ;;  %v26_v1 = vld [vmem:[#allocation3] sm:$0xff]  ;;  %v27_v2 = vld [vmem:[#allocation3 + $0x8] sm:$0xff]  ;;  %v2003_v37 = vmov 683565275  }
  0x13   :  { %v28_v3 = vld [vmem:[#allocation3 + $0x10] sm:$0xff]  ;;  %v2043_v4 = vmul.f32 %v2040_v0, %v26_v1  ;;  %v2046_v5 = vmul.f32 %v2040_v0, %v27_v2  ;;  %v29_v19 = vld [vmem:[#allocation3 + $0x18] sm:$0xff]  ;;  %v2004_v39 = vmov 2475754826   ;;  %v2005_v41 = vmov 2131351028  }
  0x14   :  { %v2050_v7 = vmul.f32 %v2040_v0, %v28_v3  ;;  %v2062_v26 = vmul.f32 %v2040_v0, %v29_v19  ;;  %v2006_v43 = vmov 2102212464   ;;  %v2007_v45 = vmov 920167782   ;;  %s2009_s0 = smov [#allocation6]  }
  0x15   :  { %v59_v6 = vand.u32 2147483647, %v2043_v4  ;;  %v62_v8 = vand.u32 2139095040, %v2043_v4  ;;  %v163_v9 = vand.u32 2147483647, %v2046_v5  ;;  %v166_v10 = vand.u32 2139095040, %v2046_v5 }
  0x16   :  { %v270_v15 = vand.u32 2139095040, %v2050_v7  ;;  %v267_v24 = vand.u32 2147483647, %v2050_v7  ;;  %v2008_v53 = vmov 1326507024   ;;  %vm61_vm12 = vcmp.lt.s32.totalorder %v2043_v4, 0 }
  0x17   :  { %v63_v11 = vshrl.u32 %v62_v8, 23  ;;  %v66_v12 = vand.u32 8388607, %v59_v6  ;;  %v167_v13 = vshrl.u32 %v166_v10, 23  ;;  %v170_v14 = vand.u32 8388607, %v163_v9 }
  0x18   :  { %v271_v18 = vshrl.u32 %v270_v15, 23  ;;  %v2070_v34 = vand.u32 8388607, %v267_v24  ;;  %vm2159_vm14 = vcmp.le.f32.partialorder %v59_v6, 0.7853982  ;;  %s1745_s1 = sshll.u32 %s2009_s0, 4  ;;  %s1746_s1 = int_to_ptr.vmem [resolvable:$true] %s1745_s1 }
  0x19   :  { %v1754_v16 = vadd.s32 4294967169, %v63_v11  ;;  %v1758_v17 = vadd.s32 4294967169, %v167_v13  ;;  %v67_v20 = vor.u32 8388608, %v66_v12  ;;  %v171_v22 = vor.u32 8388608, %v170_v14  ;;  %s1976_s23 = scalar_lea.vmem %s1746_s1, 2048  ;;  %p1981_p9 = scmp.lt.s32.totalorder %s1746_s1, %s1746_s1 }
  0x1a   :  { %v1762_v25 = vadd.s32 4294967169, %v271_v18  ;;  %p1977_p8 = scmp.ne.s32.totalorder %s1746_s1, %s1976_s23  ;;  %p1982_p10 = scmp.lt.s32.totalorder %s1976_s23, %s1976_s23 }
  0x1b   :  { %v69_v21 = vadd.s32 1, %v1754_v16  ;;  %v173_v23 = vadd.s32 1, %v1758_v17  ;;  %v2064_v30 = vshll.u32 %v67_v20, 8  ;;  %v2066_v33 = vshll.u32 %v171_v22, 8 }
  0x1c   :  { %v2072_v35 = vadd.s32 1, %v1762_v25  ;;  %p1983_p11 = por %p1982_p10, %p1981_p9 }
  0x1d   :  { %vm70_vm0 = vcmp.gt.s32.totalorder %v69_v21, 0  ;;  %vm174_vm1 = vcmp.gt.s32.totalorder %v173_v23, 0 }
  0x1e   :  { %v71_v27 = vsel %vm70_vm0, %v69_v21, 0  ;;  %v175_v31 = vsel %vm174_vm1, %v173_v23, 0  ;;  %vm278_vm6 = vcmp.gt.s32.totalorder %v2072_v35, 0  ;;  %p1984_p12 = pnand %p1983_p11, %p1977_p8 }
  0x1f   :  { %v72_v28 = vshrl.u32 %v71_v27, 5  ;;  %v73_v29 = vand.u32 31, %v71_v27  ;;  %v177_v32 = vand.u32 31, %v175_v31  ;;  %v2079_v47 = vshrl.u32 %v175_v31, 5 }
  0x21   :  { %v74_v36 = vsub.s32 32, %v73_v29  ;;  %v76_v38 = vshll.u32 %v2003_v37, %v73_v29  ;;  %v79_v40 = vshll.u32 %v2004_v39, %v73_v29  ;;  %v82_v42 = vshll.u32 %v2005_v41, %v73_v29 }
  0x22   :  { %v85_v44 = vshll.u32 %v2006_v43, %v73_v29  ;;  %v88_v46 = vshll.u32 %v2007_v45, %v73_v29  ;;  %vm91_vm2 = vcmp.lt.s32.totalorder %v72_v28, 1  ;;  %vm92_vm3 = vcmp.lt.s32.totalorder %v72_v28, 2 }
  0x23   :  { %v75_v48 = vshrl.u32 %v2003_v37, %v74_v36  ;;  %v77_v49 = vshrl.u32 %v2004_v39, %v74_v36  ;;  %v80_v50 = vshrl.u32 %v2005_v41, %v74_v36  ;;  %v83_v51 = vshrl.u32 %v2006_v43, %v74_v36 }
  0x24   :  { %v86_v52 = vshrl.u32 %v2007_v45, %v74_v36  ;;  %v89_v54 = vshrl.u32 %v2008_v53, %v74_v36  ;;  %vm94_vm4 = vcmp.lt.s32.totalorder %v72_v28, 4  ;;  %v178_v58 = vsub.s32 32, %v177_v32 }
  0x25   :  { %v78_v55 = vor.u32 %v77_v49, %v76_v38  ;;  %v81_v56 = vor.u32 %v80_v50, %v79_v40  ;;  %v84_v57 = vor.u32 %v83_v51, %v82_v42  ;;  %vm93_vm5 = vcmp.lt.s32.totalorder %v72_v28, 3 }
  0x26   :  { %v87_v59 = vor.u32 %v86_v52, %v85_v44  ;;  %v90_v60 = vor.u32 %v89_v54, %v88_v46  ;;  %v180_v61 = vshll.u32 %v2003_v37, %v177_v32  ;;  %v183_v11 = vshll.u32 %v2004_v39, %v177_v32 }
  0x27   :  { %v95_v62 = vsel %vm91_vm2, %v75_v48, %v78_v55  ;;  %v96_v63 = vsel %vm94_vm4, %v84_v57, 2102212464  ;;  %v99_v1 = vsel %vm91_vm2, %v78_v55, %v81_v56  ;;  %v103_v2 = vsel %vm91_vm2, %v81_v56, %v84_v57 }
  0x28   :  { %v97_v3 = vsel %vm93_vm5, %v81_v56, %v96_v63  ;;  %v100_v8 = vsel %vm94_vm4, %v87_v59, 920167782  ;;  %v104_v10 = vsel %vm94_vm4, %v90_v60, 1326507024  ;;  %v179_v14 = vshrl.u32 %v2003_v37, %v178_v58  ;;  %v30_v63 = vld [vmem:[#allocation3 + $0x20] sm:$0xff] }
  0x29   :  { %v101_v12 = vsel %vm93_vm5, %v84_v57, %v100_v8  ;;  %v105_v13 = vsel %vm93_vm5, %v87_v59, %v104_v10  ;;  %v181_v15 = vshrl.u32 %v2004_v39, %v178_v58  ;;  %v98_v16 = vsel %vm92_vm3, %v95_v62, %v97_v3 }
  0x2a   :  { %v102_v17 = vsel %vm92_vm3, %v99_v1, %v101_v12  ;;  %v106_v18 = vsel %vm92_vm3, %v103_v2, %v105_v13  ;;  %v184_v19 = vshrl.u32 %v2005_v41, %v178_v58  ;;  %v186_v29 = vshll.u32 %v2005_v41, %v177_v32  ;;  %v31_v1 = vld [vmem:[#allocation3 + $0x28] sm:$0xff] }
  0x2b   :  { %v2100_v20 = vmul.u32.u64.low %v2064_v30, %v106_v18  ;;  %v2101_v21 = vmul.u32.u64.high %v2064_v30, %v106_v18, %v2100_v20  ;;  %v2104_v22 = vmul.u32.u64.low %v2064_v30, %v102_v17  ;;  %v2105_v23 = vmul.u32.u64.high %v2064_v30, %v102_v17, %v2104_v22 }
  0x2c   :  { %v182_v25 = vor.u32 %v181_v15, %v180_v61  ;;  %v185_v27 = vor.u32 %v184_v19, %v183_v11  ;;  %v187_v31 = vshrl.u32 %v2006_v43, %v178_v58  ;;  %v189_v28 = vshll.u32 %v2006_v43, %v177_v32 }
  0x2d   :  { %v190_v36 = vshrl.u32 %v2007_v45, %v178_v58  ;;  %v192_v38 = vshll.u32 %v2007_v45, %v177_v32  ;;  %v193_v40 = vshrl.u32 %v2008_v53, %v178_v58  ;;  %v114_v42 = vmul.u32 %v2064_v30, %v98_v16 }
  0x2e   :  { %v188_v44 = vor.u32 %v187_v31, %v186_v29  ;;  %vm195_vm7 = vcmp.lt.s32.totalorder %v2079_v47, 1  ;;  %vm196_vm8 = vcmp.lt.s32.totalorder %v2079_v47, 2  ;;  %vm116_vm9 = vc.u32 %v2101_v21, %v2104_v22 }
  0x2f   :  { %v117_v46 = vadd.s32 1, %v2105_v23  ;;  %v191_v48 = vor.u32 %v190_v36, %v189_v28  ;;  %vm197_vm10 = vcmp.lt.s32.totalorder %v2079_v47, 3  ;;  %v194_v49 = vor.u32 %v193_v40, %v192_v38 }
  0x30   :  { %vm198_vm11 = vcmp.lt.s32.totalorder %v2079_v47, 4  ;;  %v199_v32 = vsel %vm195_vm7, %v179_v14, %v182_v25  ;;  %v203_v50 = vsel %vm195_vm7, %v182_v25, %v185_v27  ;;  %v207_v54 = vsel %vm195_vm7, %v185_v27, %v188_v44 }
  0x31   :  { %v118_v30 = vsel %vm116_vm9, %v117_v46, %v2105_v23  ;;  %v200_v51 = vsel %vm198_vm11, %v188_v44, 2102212464  ;;  %v204_v52 = vsel %vm198_vm11, %v191_v48, 920167782  ;;  %v208_v58 = vsel %vm198_vm11, %v194_v49, 1326507024 }
  0x32   :  { %v119_v55 = vadd.s32 %v118_v30, %v114_v42  ;;  %v201_v56 = vsel %vm197_vm10, %v185_v27, %v200_v51  ;;  %v205_v57 = vsel %vm197_vm10, %v188_v44, %v204_v52  ;;  %v209_v61 = vsel %vm197_vm10, %v191_v48, %v208_v58 }
  0x33   :  { %v202_v59 = vsel %vm196_vm8, %v199_v32, %v201_v56  ;;  %v206_v60 = vsel %vm196_vm8, %v203_v50, %v205_v57  ;;  %v279_v62 = vsel %vm278_vm6, %v2072_v35, 0  ;;  %v210_v3 = vsel %vm196_vm8, %v207_v54, %v209_v61 }
  0x34   :  { %v120_v2 = vadd.s32 536870912, %v119_v55  ;;  %v2133_v8 = vmul.u32.u64.low %v2066_v33, %v206_v60  ;;  %v2134_v10 = vmul.u32.u64.high %v2066_v33, %v206_v60, %v2133_v8  ;;  %v275_v13 = vor.u32 8388608, %v2070_v34 }
  0x35   :  { %v2138_v11 = vmul.u32.u64.low %v2066_v33, %v210_v3  ;;  %v2139_v12 = vmul.u32.u64.high %v2066_v33, %v210_v3, %v2138_v11  ;;  %v374_v14 = vand.u32 2139095040, %v2062_v26  ;;  %v281_v15 = vand.u32 31, %v279_v62 }
  0x36   :  { %v121_v35 = vshrl.u32 %v120_v2, 30  ;;  %v2144_v16 = vmul.f32 %v2040_v0, %v30_v63  ;;  %v2147_v47 = vmul.f32 %v2040_v0, %v31_v1  ;;  %v218_v17 = vmul.u32 %v2066_v33, %v202_v59 }
  0x37   :  { %v221_v19 = vadd.s32 1, %v2134_v10  ;;  %v282_v20 = vsub.s32 32, %v281_v15  ;;  %vm220_vm13 = vc.u32 %v2139_v12, %v2133_v8  ;;  %v2154_v34 = vshll.u32 %v275_v13, 8 }
  0x38   :  { %v122_v18 = vshll.u32 %v121_v35, 30  ;;  %v371_v23 = vand.u32 2147483647, %v2062_v26  ;;  %v375_v25 = vshrl.u32 %v374_v14, 23  ;;  %v145_v29 = vsub.s32 4, %v121_v35 }
  0x39   :  { %v222_v31 = vsel %vm220_vm13, %v221_v19, %v2134_v10  ;;  %v280_v28 = vshrl.u32 %v279_v62, 5  ;;  %v284_v38 = vshll.u32 %v2003_v37, %v281_v15  ;;  %v285_v40 = vshrl.u32 %v2004_v39, %v282_v20 }
  0x3a   :  { %v2163_v33 = vsub.s32 %v119_v55, %v122_v18  ;;  %v223_v36 = vadd.s32 %v222_v31, %v218_v17  ;;  %v287_v42 = vshll.u32 %v2004_v39, %v281_v15  ;;  %v288_v6 = vshrl.u32 %v2005_v41, %v282_v20 }
  0x3b   :  { %v290_v46 = vshll.u32 %v2005_v41, %v281_v15  ;;  %v291_v48 = vshrl.u32 %v2006_v43, %v282_v20  ;;  %v115_v49 = vadd.s32 %v2104_v22, %v2101_v21  ;;  %v293_v50 = vshll.u32 %v2006_v43, %v281_v15 }
  0x3c   :  { %v125_v44 = vsub.s32 0, %v2163_v33  ;;  %v224_v32 = vadd.s32 536870912, %v223_v36  ;;  %v1766_v30 = vadd.s32 4294967169, %v375_v25  ;;  %v146_v52 = vsel %vm61_vm12, %v145_v29, %v121_v35 }
  0x3d   :  { %v294_v54 = vshrl.u32 %v2007_v45, %v282_v20  ;;  %vm302_vm15 = vcmp.lt.s32.totalorder %v280_v28, 4  ;;  %v283_v56 = vshrl.u32 %v2003_v37, %v282_v20  ;;  %v296_v57 = vshll.u32 %v2007_v45, %v281_v15 }
  0x3e   :  { %v1755_v51 = vmin.u32 %v125_v44, %v2163_v33  ;;  %v2180_v55 = vshrl.u32 %v224_v32, 30  ;;  %v297_v21 = vshrl.u32 %v2008_v53, %v282_v20  ;;  %v286_v58 = vor.u32 %v285_v40, %v284_v38 }
  0x3f   :  { %v289_v59 = vor.u32 %v288_v6, %v287_v42  ;;  %v292_v60 = vor.u32 %v291_v48, %v290_v46  ;;  %v295_v62 = vor.u32 %v294_v54, %v293_v50  ;;  %vm299_vm0 = vcmp.lt.s32.totalorder %v280_v28, 1 }
  0x40   :  { %v127_v22 = vclz %v1755_v51  ;;  %v226_v61 = vshll.u32 %v2180_v55, 30  ;;  %vm301_vm1 = vcmp.lt.s32.totalorder %v280_v28, 3  ;;  %v298_v1 = vor.u32 %v297_v21, %v296_v57 }
  0x41   :  { %v304_v2 = vsel %vm302_vm15, %v292_v60, 2102212464  ;;  %v381_v3 = vadd.s32 1, %v1766_v30  ;;  %v148_v10 = vsel %vm2159_vm14, 0, %v146_v52  ;;  %vm300_vm2 = vcmp.lt.s32.totalorder %v280_v28, 2 }
  0x42   :  { %v1756_v63 = vadd.s32 4294967294, %v127_v22  ;;  %v2189_v11 = vsub.s32 %v223_v36, %v226_v61  ;;  %v308_v13 = vsel %vm302_vm15, %v295_v62, 920167782  ;;  %v303_v14 = vsel %vm299_vm0, %v283_v56, %v286_v58 }
  0x43   :  { %v307_v35 = vsel %vm299_vm0, %v286_v58, %v289_v59  ;;  %v309_v15 = vsel %vm301_vm1, %v292_v60, %v308_v13  ;;  %v305_v19 = vsel %vm301_vm1, %v289_v59, %v304_v2  ;;  %v311_v20 = vsel %vm299_vm0, %v289_v59, %v292_v60 }
  0x44   :  { %vm1757_vm3 = vcmp.lt.s32.totalorder %v1756_v63, 0  ;;  %v229_v18 = vsub.s32 0, %v2189_v11  ;;  %v312_v36 = vsel %vm302_vm15, %v298_v1, 1326507024  ;;  %vm165_vm4 = vcmp.lt.s32.totalorder %v2046_v5, 0 }
  0x45   :  { %v130_v17 = vsel %vm1757_vm3, 0, %v1756_v63  ;;  %v310_v40 = vsel %vm300_vm2, %v307_v35, %v309_v15  ;;  %v313_v42 = vsel %vm301_vm1, %v295_v62, %v312_v36  ;;  %vm382_vm5 = vcmp.gt.s32.totalorder %v381_v3, 0 }
  0x46   :  { %v131_v25 = vsub.s32 32, %v130_v17  ;;  %v132_v29 = vshll.u32 %v2163_v33, %v130_v17  ;;  %v135_v31 = vsub.s32 4294967266, %v130_v17  ;;  %v1759_v38 = vmin.u32 %v229_v18, %v2189_v11 }
  0x47   :  { %v314_v46 = vsel %vm300_vm2, %v311_v20, %v313_v42  ;;  %v152_v48 = vadd.s32 3, %v148_v10  ;;  %v306_v33 = vsel %vm300_vm2, %v303_v14, %v305_v19  ;;  %v378_v50 = vand.u32 8388607, %v371_v23 }
  0x48   :  { %v133_v44 = vshrl.u32 %v115_v49, %v131_v25  ;;  %v136_v6 = vadd.s32 127, %v135_v31  ;;  %v231_v32 = vclz %v1759_v38  ;;  %v383_v21 = vsel %vm382_vm5, %v381_v3, 0 }
  0x49   :  { %v2209_v52 = vmul.u32.u64.low %v2154_v34, %v314_v46  ;;  %v2210_v54 = vmul.u32.u64.high %v2154_v34, %v314_v46, %v2209_v52  ;;  %v2213_v49 = vmul.u32.u64.low %v2154_v34, %v310_v40  ;;  %v2214_v57 = vmul.u32.u64.high %v2154_v34, %v310_v40, %v2213_v49 }
  0x4a   :  { %v134_v30 = vor.u32 %v133_v44, %v132_v29  ;;  %v137_v51 = vshll.u32 %v136_v6, 23  ;;  %v1760_v56 = vadd.s32 4294967294, %v231_v32  ;;  %v249_v28 = vsub.s32 4, %v2180_v55 }
  0x4b   :  { %v385_v59 = vand.u32 31, %v383_v21  ;;  %v2218_v60 = vand.u32 3, %v152_v48  ;;  %v219_v61 = vadd.s32 %v2133_v8, %v2139_v12  ;;  %v379_v62 = vor.u32 8388608, %v378_v50 }
  0x4c   :  { %v138_v22 = vor.u32 4788187, %v137_v51  ;;  %v141_v58 = vcvt.s32.f32 %v134_v30  ;;  %vm1761_vm6 = vcmp.lt.s32.totalorder %v1760_v56, 0  ;;  %v322_v2 = vmul.u32 %v2154_v34, %v306_v33 }
  0x4d   :  { %v234_v1 = vsel %vm1761_vm6, 0, %v1760_v56  ;;  %vm324_vm7 = vc.u32 %v2210_v54, %v2213_v49  ;;  %v325_v14 = vadd.s32 1, %v2214_v57  ;;  %vm2229_vm8 = vcmp.le.f32.partialorder %v163_v9, 0.7853982 }
  0x4e   :  { %v139_v63 = vand.u32 2147483647, %v138_v22  ;;  %v235_v3 = vsub.s32 32, %v234_v1  ;;  %v236_v10 = vshll.u32 %v2189_v11, %v234_v1  ;;  %v239_v13 = vsub.s32 4294967266, %v234_v1 }
  0x4f   :  { %v250_v12 = vsel %vm165_vm4, %v249_v28, %v2180_v55  ;;  %v2236_v34 = vshrl.u32 %v383_v21, 5  ;;  %v386_v15 = vsub.s32 32, %v385_v59  ;;  %v326_v11 = vsel %vm324_vm7, %v325_v14, %v2214_v57 }
  0x50   :  { %v142_v35 = vmul.f32 %v141_v58, %v139_v63  ;;  %v237_v17 = vshrl.u32 %v219_v61, %v235_v3  ;;  %v240_v18 = vadd.s32 127, %v239_v13  ;;  %v388_v19 = vshll.u32 %v2003_v37, %v385_v59 }
  0x51   :  { %v327_v25 = vadd.s32 %v326_v11, %v322_v2  ;;  %v389_v9 = vshrl.u32 %v2004_v39, %v386_v15  ;;  %v391_v29 = vshll.u32 %v2004_v39, %v385_v59  ;;  %v392_v38 = vshrl.u32 %v2005_v41, %v386_v15 }
  0x52   :  { %v143_v20 = vxor.u32 2147483648, %v142_v35  ;;  %v238_v31 = vor.u32 %v237_v17, %v236_v10  ;;  %v241_v36 = vshll.u32 %v240_v18, 23  ;;  %v394_v55 = vshll.u32 %v2005_v41, %v385_v59 }
  0x53   :  { %v328_v42 = vadd.s32 536870912, %v327_v25  ;;  %v395_v44 = vshrl.u32 %v2006_v43, %v386_v15  ;;  %v397_v6 = vshll.u32 %v2006_v43, %v385_v59  ;;  %v390_v33 = vor.u32 %v389_v9, %v388_v19 }
  0x54   :  { %v144_v40 = vsel %vm61_vm12, %v143_v20, %v142_v35  ;;  %v242_v48 = vor.u32 4788187, %v241_v36  ;;  %v245_v32 = vcvt.s32.f32 %v238_v31  ;;  %v393_v30 = vor.u32 %v392_v38, %v391_v29 }
  0x55   :  { %v147_v46 = vsel %vm2159_vm14, %v2043_v4, %v144_v40  ;;  %v329_v50 = vshrl.u32 %v328_v42, 30  ;;  %v398_v51 = vshrl.u32 %v2007_v45, %v386_v15  ;;  %v400_v56 = vshll.u32 %v2007_v45, %v385_v59 }
  0x56   :  { %1890 = vcosq.f32 %v147_v46  ;;  %v243_v52 = vand.u32 2147483647, %v242_v48  ;;  %v401_v57 = vshrl.u32 %v2008_v53, %v386_v15  ;;  %vm403_vm9 = vcmp.lt.s32.totalorder %v2236_v34, 1 }
  0x57   :  { %1892 = vsinq.f32 %v147_v46  ;;  %v330_v21 = vshll.u32 %v329_v50, 30  ;;  %v399_v22 = vor.u32 %v398_v51, %v397_v6  ;;  %v2255_v27 = vshll.u32 %v379_v62, 8 }
  0x58   :  { %vm155_vm10 = vcmp.eq.s32.totalorder %v2218_v60, 0  ;;  %v246_v58 = vmul.f32 %v245_v32, %v243_v52  ;;  %v252_v28 = vsel %vm2229_vm8, 0, %v250_v12  ;;  %v387_v61 = vshrl.u32 %v2003_v37, %v386_v15 }
  0x59   :  { %v396_v63 = vor.u32 %v395_v44, %v394_v55  ;;  %vm154_vm11 = vcmp.lt.s32.totalorder %v2218_v60, 2  ;;  %vm269_vm12 = vcmp.lt.s32.totalorder %v2050_v7, 0  ;;  %v2263_v59 = vsub.s32 %v327_v25, %v330_v21 }
  0x5a   :  { %v402_v1 = vor.u32 %v401_v57, %v400_v56  ;;  %vm405_vm13 = vcmp.lt.s32.totalorder %v2236_v34, 3  ;;  %vm406_vm14 = vcmp.lt.s32.totalorder %v2236_v34, 4  ;;  %vm151_vm15 = vweird.f32 %v2043_v4 }
  0x5b   :  { %v247_v62 = vxor.u32 2147483648, %v246_v58  ;;  %vm404_vm0 = vcmp.lt.s32.totalorder %v2236_v34, 2  ;;  %v408_v2 = vsel %vm406_vm14, %v396_v63, 2102212464  ;;  %v411_v3 = vsel %vm403_vm9, %v390_v33, %v393_v30 }
  0x5c   :  { %v256_v10 = vadd.s32 3, %v252_v28  ;;  %v333_v13 = vsub.s32 0, %v2263_v59  ;;  %v353_v14 = vsub.s32 4, %v329_v50  ;;  %v412_v35 = vsel %vm406_vm14, %v399_v22, 920167782 }
  0x5d   :  { %v248_v12 = vsel %vm165_vm4, %v247_v62, %v246_v58  ;;  %v407_v15 = vsel %vm403_vm9, %v387_v61, %v390_v33  ;;  %v409_v17 = vsel %vm405_vm13, %v393_v30, %v408_v2  ;;  %v413_v18 = vsel %vm405_vm13, %v396_v63, %v412_v35 }
  0x5e   :  { %v251_v11 = vsel %vm2229_vm8, %v2046_v5, %v248_v12  ;;  %vm2289_vm1 = vcmp.le.f32.partialorder %v267_v24, 0.7853982  ;;  %v1763_v20 = vmin.u32 %v333_v13, %v2263_v59  ;;  %v414_v25 = vsel %vm404_vm0, %v411_v3, %v413_v18 }
  0x5f   :  { %v415_v9 = vsel %vm403_vm9, %v393_v30, %v396_v63  ;;  %1894 = vcosq.f32 %v251_v11  ;;  %v416_v29 = vsel %vm406_vm14, %v402_v1, 1326507024  ;;  %vm158_vm2 = vcmp.eq.s32.totalorder %v2218_v60, 2 }
  0x60   :  { %v2301_v8 = vmul.u32.u64.low %v2255_v27, %v414_v25  ;;  %v2302_v31 = vmul.u32.u64.high %v2255_v27, %v414_v25, %v2301_v8  ;;  %v1891_v24 = vpop.eup %1890  ;;  %1896 = vsinq.f32 %v251_v11  ;;  %v257_v36 = vand.u32 3, %v256_v10 }
  0x61   :  { %v335_v38 = vclz %v1763_v20  ;;  %v1893_v55 = vpop.eup %1892  ;;  %v159_v40 = vxor.u32 2147483648, %v1891_v24  ;;  %v323_v42 = vadd.s32 %v2213_v49, %v2210_v54  ;;  %v417_v44 = vsel %vm405_vm13, %v399_v22, %v416_v29 }
  0x62   :  { %v475_v6 = vand.u32 2147483647, %v2144_v16  ;;  %v156_v46 = vxor.u32 2147483648, %v1893_v55  ;;  %v410_v32 = vsel %vm404_vm0, %v407_v15, %v409_v17  ;;  %v418_v33 = vsel %vm404_vm0, %v415_v9, %v417_v44 }
  0x63   :  { %v1764_v48 = vadd.s32 4294967294, %v335_v38  ;;  %v160_v30 = vsel %vm158_vm2, %v159_v40, %v1893_v55  ;;  %v354_v51 = vsel %vm269_vm12, %v353_v14, %v329_v50  ;;  %vm255_vm3 = vweird.f32 %v2046_v5 }
  0x64   :  { %v2318_v52 = vmul.u32.u64.low %v2255_v27, %v418_v33  ;;  %v2319_v54 = vmul.u32.u64.high %v2255_v27, %v418_v33, %v2318_v52  ;;  %v157_v49 = vsel %vm155_vm10, %v1891_v24, %v156_v46  ;;  %v429_v56 = vadd.s32 1, %v2302_v31 }
  0x65   :  { %vm1765_vm4 = vcmp.lt.s32.totalorder %v1764_v48, 0  ;;  %v478_v57 = vand.u32 2139095040, %v2144_v16  ;;  %v161_v34 = vsel %vm154_vm11, %v157_v49, %v160_v30  ;;  %vm258_vm5 = vcmp.lt.s32.totalorder %v257_v36, 2 }
  0x66   :  { %v338_v21 = vsel %vm1765_vm4, 0, %v1764_v48  ;;  %v426_v50 = vmul.u32 %v2255_v27, %v410_v32  ;;  %v162_v22 = vsel %vm151_vm15, nan, %v161_v34  ;;  %vm259_vm6 = vcmp.eq.s32.totalorder %v257_v36, 0 }
  0x67   :  { %v339_v58 = vsub.s32 32, %v338_v21  ;;  %v340_v28 = vshll.u32 %v2263_v59, %v338_v21  ;;  %v343_v61 = vsub.s32 4294967266, %v338_v21  ;;  %v356_v63 = vsel %vm2289_vm1, 0, %v354_v51  ;;  %1723 = vst [vmem:[#allocation6] sm:$0xff] %v162_v22 }
  0x68   :  { %vm428_vm7 = vc.u32 %v2319_v54, %v2301_v8  ;;  %v479_v60 = vshrl.u32 %v478_v57, 23  ;;  %v482_v4 = vand.u32 8388607, %v475_v6  ;;  %vm262_vm8 = vcmp.eq.s32.totalorder %v257_v36, 2 }
  0x69   :  { %v341_v1 = vshrl.u32 %v323_v42, %v339_v58  ;;  %v344_v62 = vadd.s32 127, %v343_v61  ;;  %v430_v27 = vsel %vm428_vm7, %v429_v56, %v2302_v31  ;;  %v1895_v2 = vpop.eup %1894  ;;  %v579_v10 = vand.u32 2147483647, %v2147_v47 }
  0x6a   :  { %v431_v59 = vadd.s32 %v430_v27, %v426_v50  ;;  %v1770_v3 = vadd.s32 4294967169, %v479_v60  ;;  %v1897_v13 = vpop.eup %1896  ;;  %v263_v14 = vxor.u32 2147483648, %v1895_v2  ;;  %v582_v15 = vand.u32 2139095040, %v2147_v47 }
  0x6b   :  { %v342_v35 = vor.u32 %v341_v1, %v340_v28  ;;  %v345_v12 = vshll.u32 %v344_v62, 23  ;;  %v260_v17 = vxor.u32 2147483648, %v1897_v13  ;;  %v360_v18 = vadd.s32 3, %v356_v63 }
  0x6c   :  { %v432_v11 = vadd.s32 536870912, %v431_v59  ;;  %v485_v20 = vadd.s32 1, %v1770_v3  ;;  %v264_v25 = vsel %vm262_vm8, %v263_v14, %v1897_v13  ;;  %v483_v31 = vor.u32 8388608, %v482_v4 }
  0x6d   :  { %v346_v9 = vor.u32 4788187, %v345_v12  ;;  %v349_v29 = vcvt.s32.f32 %v342_v35  ;;  %v261_v24 = vsel %vm259_vm6, %v1895_v2, %v260_v17  ;;  %v583_v55 = vshrl.u32 %v582_v15, 23 }
  0x6e   :  { %v433_v38 = vshrl.u32 %v432_v11, 30  ;;  %vm486_vm9 = vcmp.gt.s32.totalorder %v485_v20, 0  ;;  %v265_v40 = vsel %vm258_vm5, %v261_v24, %v264_v25  ;;  %v586_v46 = vand.u32 8388607, %v579_v10 }
  0x6f   :  { %v347_v42 = vand.u32 2147483647, %v346_v9  ;;  %v487_v44 = vsel %vm486_vm9, %v485_v20, 0  ;;  %v266_v48 = vsel %vm255_vm3, nan, %v265_v40  ;;  %v2347_v30 = vand.u32 3, %v360_v18 }
  0x70   :  { %v434_v32 = vshll.u32 %v433_v38, 30  ;;  %vm373_vm10 = vcmp.lt.s32.totalorder %v2062_v26, 0  ;;  %v489_v51 = vand.u32 31, %v487_v44  ;;  %1724 = vst [vmem:[#allocation6 + $0x8] sm:$0xff] %v266_v48  ;;  %v427_v36 = vadd.s32 %v2301_v8, %v2319_v54 }
  0x71   :  { %v350_v33 = vmul.f32 %v349_v29, %v347_v42  ;;  %v2354_v49 = vshll.u32 %v483_v31, 8  ;;  %v1774_v56 = vadd.s32 4294967169, %v583_v55  ;;  %v457_v34 = vsub.s32 4, %v433_v38 }
  0x72   :  { %v2352_v52 = vsub.s32 %v431_v59, %v434_v32  ;;  %v490_v5 = vsub.s32 32, %v489_v51  ;;  %v587_v21 = vor.u32 8388608, %v586_v46  ;;  %v2357_v22 = vshrl.u32 %v487_v44, 5 }
  0x73   :  { %v351_v57 = vxor.u32 2147483648, %v350_v33  ;;  %v492_v58 = vshll.u32 %v2003_v37, %v489_v51  ;;  %v495_v28 = vshll.u32 %v2004_v39, %v489_v51  ;;  %v498_v63 = vshll.u32 %v2005_v41, %v489_v51 }
  0x74   :  { %v437_v50 = vsub.s32 0, %v2352_v52  ;;  %v493_v54 = vshrl.u32 %v2004_v39, %v490_v5  ;;  %v496_v61 = vshrl.u32 %v2005_v41, %v490_v5  ;;  %v499_v62 = vshrl.u32 %v2006_v43, %v490_v5 }
  0x75   :  { %v352_v8 = vsel %vm269_vm12, %v351_v57, %v350_v33  ;;  %v589_v27 = vadd.s32 1, %v1774_v56  ;;  %vm2373_vm11 = vcmp.le.f32.partialorder %v371_v23, 0.7853982  ;;  %v491_v2 = vshrl.u32 %v2003_v37, %v490_v5 }
  0x76   :  { %v355_v60 = vsel %vm2289_vm1, %v2050_v7, %v352_v8  ;;  %v1767_v1 = vmin.u32 %v437_v50, %v2352_v52  ;;  %v501_v59 = vshll.u32 %v2006_v43, %v489_v51  ;;  %v2379_v3 = vshll.u32 %v587_v21, 8 }
  0x77   :  { %1898 = vcosq.f32 %v355_v60  ;;  %v494_v13 = vor.u32 %v493_v54, %v492_v58  ;;  %v497_v14 = vor.u32 %v496_v61, %v495_v28  ;;  %vm366_vm12 = vcmp.eq.s32.totalorder %v2347_v30, 2 }
  0x78   :  { %1900 = vsinq.f32 %v355_v60  ;;  %v439_v19 = vclz %v1767_v1  ;;  %v500_v35 = vor.u32 %v499_v62, %v498_v63  ;;  %v502_v12 = vshrl.u32 %v2007_v45, %v490_v5 }
  0x79   :  { %v504_v23 = vshll.u32 %v2007_v45, %v489_v51  ;;  %vm507_vm13 = vcmp.lt.s32.totalorder %v2357_v22, 1  ;;  %vm363_vm14 = vcmp.eq.s32.totalorder %v2347_v30, 0  ;;  %v458_v17 = vsel %vm373_vm10, %v457_v34, %v433_v38 }
  0x7a   :  { %v1768_v15 = vadd.s32 4294967294, %v439_v19  ;;  %v505_v18 = vshrl.u32 %v2008_v53, %v490_v5  ;;  %vm510_vm15 = vcmp.lt.s32.totalorder %v2357_v22, 4  ;;  %vm362_vm0 = vcmp.lt.s32.totalorder %v2347_v30, 2 }
  0x7b   :  { %v503_v11 = vor.u32 %v502_v12, %v501_v59  ;;  %vm508_vm1 = vcmp.lt.s32.totalorder %v2357_v22, 2  ;;  %vm509_vm2 = vcmp.lt.s32.totalorder %v2357_v22, 3  ;;  %v511_v20 = vsel %vm507_vm13, %v491_v2, %v494_v13 }
  0x7c   :  { %vm359_vm3 = vweird.f32 %v2050_v7  ;;  %vm1769_vm4 = vcmp.lt.s32.totalorder %v1768_v15, 0  ;;  %v506_v25 = vor.u32 %v505_v18, %v504_v23  ;;  %v512_v9 = vsel %vm510_vm15, %v500_v35, 2102212464 }
  0x7d   :  { %v515_v29 = vsel %vm507_vm13, %v494_v13, %v497_v14  ;;  %v442_v31 = vsel %vm1769_vm4, 0, %v1768_v15  ;;  %v516_v24 = vsel %vm510_vm15, %v503_v11, 920167782  ;;  %v519_v38 = vsel %vm507_vm13, %v497_v14, %v500_v35 }
  0x7e   :  { %vm590_vm5 = vcmp.gt.s32.totalorder %v589_v27, 0  ;;  %v443_v55 = vsub.s32 32, %v442_v31  ;;  %v444_v40 = vshll.u32 %v2352_v52, %v442_v31  ;;  %v447_v42 = vsub.s32 4294967266, %v442_v31 }
  0x7f   :  { %v517_v44 = vsel %vm509_vm2, %v500_v35, %v516_v24  ;;  %v513_v46 = vsel %vm509_vm2, %v497_v14, %v512_v9  ;;  %v520_v32 = vsel %vm510_vm15, %v506_v25, 1326507024  ;;  %v591_v33 = vsel %vm590_vm5, %v589_v27, 0 }
  0x80   :  { %v518_v48 = vsel %vm508_vm1, %v515_v29, %v517_v44  ;;  %v445_v51 = vshrl.u32 %v427_v36, %v443_v55  ;;  %v448_v56 = vadd.s32 127, %v447_v42  ;;  %v460_v57 = vsel %vm2373_vm11, 0, %v458_v17 }
  0x81   :  { %v521_v52 = vsel %vm509_vm2, %v503_v11, %v520_v32  ;;  %v1899_v34 = vpop.eup %1898  ;;  %v2420_v21 = vmul.u32.u64.low %v2354_v49, %v518_v48  ;;  %v2421_v50 = vmul.u32.u64.high %v2354_v49, %v518_v48, %v2420_v21  ;;  %v593_v58 = vand.u32 31, %v591_v33  ;;  %v32_v32 = vld [vmem:[#allocation3 + $0x30] sm:$0xff] }
  0x82   :  { %v522_v5 = vsel %vm508_vm1, %v519_v38, %v521_v52  ;;  %v1901_v28 = vpop.eup %1900  ;;  %v367_v8 = vxor.u32 2147483648, %v1899_v34  ;;  %v446_v36 = vor.u32 %v445_v51, %v444_v40  ;;  %v449_v54 = vshll.u32 %v448_v56, 23 }
  0x83   :  { %v514_v61 = vsel %vm508_vm1, %v511_v20, %v513_v46  ;;  %v364_v63 = vxor.u32 2147483648, %v1901_v28  ;;  %v2427_v60 = vmul.u32.u64.low %v2354_v49, %v522_v5  ;;  %v2428_v1 = vmul.u32.u64.high %v2354_v49, %v522_v5, %v2427_v60 }
  0x84   :  { %v594_v62 = vsub.s32 32, %v593_v58  ;;  %v368_v27 = vsel %vm366_vm12, %v367_v8, %v1901_v28  ;;  %v450_v2 = vor.u32 4788187, %v449_v54  ;;  %v453_v59 = vcvt.s32.f32 %v446_v36 }
  0x85   :  { %v596_v19 = vshll.u32 %v2003_v37, %v593_v58  ;;  %v365_v13 = vsel %vm363_vm14, %v1899_v34, %v364_v63  ;;  %v530_v14 = vmul.u32 %v2354_v49, %v514_v61  ;;  %v533_v22 = vadd.s32 1, %v2421_v50 }
  0x86   :  { %v597_v35 = vshrl.u32 %v2004_v39, %v594_v62  ;;  %v369_v12 = vsel %vm362_vm0, %v365_v13, %v368_v27  ;;  %v451_v23 = vand.u32 2147483647, %v450_v2  ;;  %v599_v15 = vshll.u32 %v2004_v39, %v593_v58  ;;  %v33_v2 = vld [vmem:[#allocation3 + $0x38] sm:$0xff] }
  0x87   :  { %v600_v17 = vshrl.u32 %v2005_v41, %v594_v62  ;;  %v370_v18 = vsel %vm359_vm3, nan, %v369_v12  ;;  %v464_v11 = vadd.s32 3, %v460_v57  ;;  %vm532_vm6 = vc.u32 %v2428_v1, %v2420_v21 }
  0x88   :  { %v592_v49 = vshrl.u32 %v591_v33, 5  ;;  %v454_v20 = vmul.f32 %v453_v59, %v451_v23  ;;  %v534_v25 = vsel %vm532_vm6, %v533_v22, %v2421_v50  ;;  %v598_v9 = vor.u32 %v597_v35, %v596_v19  ;;  %1725 = vst [vmem:[#allocation6 + $0x10] sm:$0xff] %v370_v18 }
  0x89   :  { %v602_v30 = vshll.u32 %v2005_v41, %v593_v58  ;;  %v535_v29 = vadd.s32 %v534_v25, %v530_v14  ;;  %v603_v31 = vshrl.u32 %v2006_v43, %v594_v62  ;;  %v605_v24 = vshll.u32 %v2006_v43, %v593_v58 }
  0x8a   :  { %v606_v7 = vshrl.u32 %v2007_v45, %v594_v62  ;;  %v455_v38 = vxor.u32 2147483648, %v454_v20  ;;  %v601_v55 = vor.u32 %v600_v17, %v599_v15  ;;  %v608_v40 = vshll.u32 %v2007_v45, %v593_v58 }
  0x8b   :  { %v609_v42 = vshrl.u32 %v2008_v53, %v594_v62  ;;  %v536_v44 = vadd.s32 536870912, %v535_v29  ;;  %v604_v46 = vor.u32 %v603_v31, %v602_v30  ;;  %vm611_vm7 = vcmp.lt.s32.totalorder %v592_v49, 1 }
  0x8c   :  { %v607_v48 = vor.u32 %v606_v7, %v605_v24  ;;  %v456_v33 = vsel %vm373_vm10, %v455_v38, %v454_v20  ;;  %v595_v51 = vshrl.u32 %v2003_v37, %v594_v62  ;;  %vm614_vm8 = vcmp.lt.s32.totalorder %v592_v49, 4 }
  0x8d   :  { %v610_v56 = vor.u32 %v609_v42, %v608_v40  ;;  %v459_v57 = vsel %vm2373_vm11, %v2062_v26, %v456_v33  ;;  %v537_v52 = vshrl.u32 %v536_v44, 30  ;;  %vm613_vm9 = vcmp.lt.s32.totalorder %v592_v49, 3 }
  0x8e   :  { %v616_v34 = vsel %vm614_vm8, %v604_v46, 2102212464  ;;  %1902 = vcosq.f32 %v459_v57  ;;  %vm612_vm12 = vcmp.lt.s32.totalorder %v592_v49, 2  ;;  %v619_v5 = vsel %vm611_vm7, %v598_v9, %v601_v55 }
  0x8f   :  { %v620_v50 = vsel %vm614_vm8, %v607_v48, 920167782  ;;  %v2463_v58 = vmul.f32 %v2040_v0, %v32_v32  ;;  %1904 = vsinq.f32 %v459_v57  ;;  %v538_v28 = vshll.u32 %v537_v52, 30 }
  0x90   :  { %v623_v8 = vsel %vm611_vm7, %v601_v55, %v604_v46  ;;  %v615_v4 = vsel %vm611_vm7, %v595_v51, %v598_v9  ;;  %v617_v36 = vsel %vm613_vm9, %v601_v55, %v616_v34  ;;  %v621_v54 = vsel %vm613_vm9, %v604_v46, %v620_v50 }
  0x91   :  { %v624_v61 = vsel %vm614_vm8, %v610_v56, 1326507024  ;;  %v2470_v63 = vsub.s32 %v535_v29, %v538_v28  ;;  %v561_v60 = vsub.s32 4, %v537_v52  ;;  %v622_v62 = vsel %vm612_vm12, %v619_v5, %v621_v54 }
  0x92   :  { %v625_v27 = vsel %vm613_vm9, %v607_v48, %v624_v61  ;;  %v465_v59 = vand.u32 3, %v464_v11  ;;  %v2476_v13 = vmul.u32.u64.low %v2379_v3, %v622_v62  ;;  %v2477_v14 = vmul.u32.u64.high %v2379_v3, %v622_v62, %v2476_v13 }
  0x93   :  { %v626_v19 = vsel %vm612_vm12, %v623_v8, %v625_v27  ;;  %v541_v22 = vsub.s32 0, %v2470_v63  ;;  %v618_v35 = vsel %vm612_vm12, %v615_v4, %v617_v36  ;;  %vm477_vm10 = vcmp.lt.s32.totalorder %v2144_v16, 0 }
  0x94   :  { %v2482_v12 = vmul.u32.u64.low %v2379_v3, %v626_v19  ;;  %v2483_v23 = vmul.u32.u64.high %v2379_v3, %v626_v19, %v2482_v12  ;;  %v686_v15 = vand.u32 2139095040, %v2463_v58  ;;  %v2488_v17 = vmul.f32 %v2040_v0, %v33_v2 }
  0x95   :  { %v1771_v18 = vmin.u32 %v541_v22, %v2470_v63  ;;  %v562_v11 = vsel %vm477_vm10, %v561_v60, %v537_v52  ;;  %vm463_vm11 = vweird.f32 %v2062_v26  ;;  %v634_v49 = vmul.u32 %v2379_v3, %v618_v35 }
  0x96   :  { %v637_v20 = vadd.s32 1, %v2477_v14  ;;  %v687_v25 = vshrl.u32 %v686_v15, 23  ;;  %vm466_vm13 = vcmp.lt.s32.totalorder %v465_v59, 2  ;;  %vm2498_vm14 = vcmp.le.f32.partialorder %v475_v6, 0.7853982 }
  0x97   :  { %v543_v30 = vclz %v1771_v18  ;;  %v683_v29 = vand.u32 2147483647, %v2463_v58  ;;  %vm470_vm15 = vcmp.eq.s32.totalorder %v465_v59, 2  ;;  %v564_v24 = vsel %vm2498_vm14, 0, %v562_v11 }
  0x98   :  { %v1903_v31 = vpop.eup %1902  ;;  %vm636_vm0 = vc.u32 %v2483_v23, %v2476_v13  ;;  %v1778_v3 = vadd.s32 4294967169, %v687_v25  ;;  %vm467_vm1 = vcmp.eq.s32.totalorder %v465_v59, 0  ;;  %v531_v42 = vadd.s32 %v2420_v21, %v2428_v1 }
  0x99   :  { %v1905_v7 = vpop.eup %1904  ;;  %v471_v38 = vxor.u32 2147483648, %v1903_v31  ;;  %v1772_v55 = vadd.s32 4294967294, %v543_v30  ;;  %v638_v6 = vsel %vm636_vm0, %v637_v20, %v2477_v14  ;;  %v568_v32 = vadd.s32 3, %v564_v24 }
  0x9a   :  { %v468_v40 = vxor.u32 2147483648, %v1905_v7  ;;  %v639_v44 = vadd.s32 %v638_v6, %v634_v49  ;;  %v693_v46 = vadd.s32 1, %v1778_v3  ;;  %v690_v33 = vand.u32 8388607, %v683_v29 }
  0x9b   :  { %v472_v48 = vsel %vm470_vm15, %v471_v38, %v1905_v7  ;;  %vm1773_vm2 = vcmp.lt.s32.totalorder %v1772_v55, 0  ;;  %v790_v8 = vand.u32 2139095040, %v2488_v17  ;;  %v2518_v61 = vand.u32 3, %v568_v32 }
  0x9c   :  { %v469_v51 = vsel %vm467_vm1, %v1903_v31, %v468_v40  ;;  %v546_v56 = vsel %vm1773_vm2, 0, %v1772_v55  ;;  %v640_v57 = vadd.s32 536870912, %v639_v44  ;;  %vm694_vm3 = vcmp.gt.s32.totalorder %v693_v46, 0 }
  0x9d   :  { %v473_v52 = vsel %vm466_vm13, %v469_v51, %v472_v48  ;;  %v547_v34 = vsub.s32 32, %v546_v56  ;;  %v548_v5 = vshll.u32 %v2470_v63, %v546_v56  ;;  %v551_v50 = vsub.s32 4294967266, %v546_v56 }
  0x9e   :  { %v474_v21 = vsel %vm463_vm11, nan, %v473_v52  ;;  %v2515_v1 = vshrl.u32 %v640_v57, 30  ;;  %v695_v28 = vsel %vm694_vm3, %v693_v46, 0  ;;  %v787_v62 = vand.u32 2147483647, %v2488_v17 }
  0x9f   :  { %v549_v4 = vshrl.u32 %v531_v42, %v547_v34  ;;  %v552_v36 = vadd.s32 127, %v551_v50  ;;  %v697_v54 = vand.u32 31, %v695_v28  ;;  %1726 = vst [vmem:[#allocation6 + $0x18] sm:$0xff] %v474_v21  ;;  %v635_v26 = vadd.s32 %v2476_v13, %v2483_v23 }
  0xa0   :  { %v642_v60 = vshll.u32 %v2515_v1, 30  ;;  %v691_v19 = vor.u32 8388608, %v690_v33  ;;  %v2525_v14 = vshrl.u32 %v695_v28, 5  ;;  %v791_v22 = vshrl.u32 %v790_v8, 23 }
  0xa1   :  { %v550_v63 = vor.u32 %v549_v4, %v548_v5  ;;  %v553_v27 = vshll.u32 %v552_v36, 23  ;;  %v698_v2 = vsub.s32 32, %v697_v54  ;;  %v700_v15 = vshll.u32 %v2003_v37, %v697_v54 }
  0xa2   :  { %v2523_v59 = vsub.s32 %v639_v44, %v642_v60  ;;  %v703_v18 = vshll.u32 %v2004_v39, %v697_v54  ;;  %v706_v13 = vshll.u32 %v2005_v41, %v697_v54  ;;  %v709_v30 = vshll.u32 %v2006_v43, %v697_v54 }
  0xa3   :  { %v554_v35 = vor.u32 4788187, %v553_v27  ;;  %v557_v12 = vcvt.s32.f32 %v550_v63  ;;  %v701_v49 = vshrl.u32 %v2004_v39, %v698_v2  ;;  %v704_v20 = vshrl.u32 %v2005_v41, %v698_v2 }
  0xa4   :  { %v645_v11 = vsub.s32 0, %v2523_v59  ;;  %v707_v25 = vshrl.u32 %v2006_v43, %v698_v2  ;;  %v710_v31 = vshrl.u32 %v2007_v45, %v698_v2  ;;  %vm581_vm4 = vcmp.lt.s32.totalorder %v2147_v47, 0 }
  0xa5   :  { %v555_v23 = vand.u32 2147483647, %v554_v35  ;;  %v665_v3 = vsub.s32 4, %v2515_v1  ;;  %v2539_v7 = vshll.u32 %v691_v19, 8  ;;  %v2543_v38 = vand.u32 8388607, %v787_v62 }
  0xa6   :  { %v1775_v24 = vmin.u32 %v645_v11, %v2523_v59  ;;  %v699_v6 = vshrl.u32 %v2003_v37, %v698_v2  ;;  %v712_v40 = vshll.u32 %v2007_v45, %v697_v54  ;;  %v1782_v42 = vadd.s32 4294967169, %v791_v22  ;;  %v34_v35 = vld [vmem:[#allocation3 + $0x40] sm:$0xff] }
  0xa7   :  { %v558_v55 = vmul.f32 %v557_v12, %v555_v23  ;;  %v702_v46 = vor.u32 %v701_v49, %v700_v15  ;;  %v705_v48 = vor.u32 %v704_v20, %v703_v18  ;;  %v711_v32 = vor.u32 %v710_v31, %v709_v30 }
  0xa8   :  { %v647_v44 = vclz %v1775_v24  ;;  %v708_v51 = vor.u32 %v707_v25, %v706_v13  ;;  %v713_v56 = vshrl.u32 %v2008_v53, %v698_v2  ;;  %vm715_vm5 = vcmp.lt.s32.totalorder %v2525_v14, 1 }
  0xa9   :  { %v559_v33 = vxor.u32 2147483648, %v558_v55  ;;  %vm2551_vm6 = vcmp.le.f32.partialorder %v579_v10, 0.7853982  ;;  %vm716_vm7 = vcmp.lt.s32.totalorder %v2525_v14, 2  ;;  %vm717_vm8 = vcmp.lt.s32.totalorder %v2525_v14, 3 }
  0xaa   :  { %v1776_v52 = vadd.s32 4294967294, %v647_v44  ;;  %vm718_vm9 = vcmp.lt.s32.totalorder %v2525_v14, 4  ;;  %v714_v5 = vor.u32 %v713_v56, %v712_v40  ;;  %v719_v50 = vsel %vm715_vm5, %v699_v6, %v702_v46 }
  0xab   :  { %v560_v34 = vsel %vm477_vm10, %v559_v33, %v558_v55  ;;  %v720_v10 = vsel %vm718_vm9, %v708_v51, 2102212464  ;;  %v723_v28 = vsel %vm715_vm5, %v702_v46, %v705_v48  ;;  %v724_v8 = vsel %vm718_vm9, %v711_v32, 920167782 }
  0xac   :  { %v563_v21 = vsel %vm2498_vm14, %v2144_v16, %v560_v34  ;;  %vm1777_vm12 = vcmp.lt.s32.totalorder %v1776_v52, 0  ;;  %v721_v36 = vsel %vm717_vm8, %v705_v48, %v720_v10  ;;  %v725_v54 = vsel %vm717_vm8, %v708_v51, %v724_v8 }
  0xad   :  { %1906 = vcosq.f32 %v563_v21  ;;  %v650_v4 = vsel %vm1777_vm12, 0, %v1776_v52  ;;  %v666_v27 = vsel %vm581_vm4, %v665_v3, %v2515_v1  ;;  %v726_v2 = vsel %vm716_vm7, %v723_v28, %v725_v54 }
  0xae   :  { %1908 = vsinq.f32 %v563_v21  ;;  %v651_v60 = vsub.s32 32, %v650_v4  ;;  %v652_v9 = vshll.u32 %v2523_v59, %v650_v4  ;;  %v655_v63 = vsub.s32 4294967266, %v650_v4 }
  0xaf   :  { %v727_v19 = vsel %vm715_vm5, %v705_v48, %v708_v51  ;;  %v728_v22 = vsel %vm718_vm9, %v714_v5, 1326507024  ;;  %v797_v18 = vadd.s32 1, %v1782_v42  ;;  %v722_v11 = vsel %vm716_vm7, %v719_v50, %v721_v36 }
  0xb0   :  { %v653_v12 = vshrl.u32 %v635_v26, %v651_v60  ;;  %v656_v15 = vadd.s32 127, %v655_v63  ;;  %v729_v59 = vsel %vm717_vm8, %v711_v32, %v728_v22  ;;  %v2601_v30 = vmul.f32 %v2040_v0, %v34_v35 }
  0xb1   :  { %v730_v1 = vsel %vm716_vm7, %v727_v19, %v729_v59  ;;  %v2592_v49 = vmul.u32.u64.low %v2539_v7, %v726_v2  ;;  %v2593_v20 = vmul.u32.u64.high %v2539_v7, %v726_v2, %v2592_v49  ;;  %vm567_vm10 = vweird.f32 %v2144_v16 }
  0xb2   :  { %v654_v13 = vor.u32 %v653_v12, %v652_v9  ;;  %v657_v23 = vshll.u32 %v656_v15, 23  ;;  %v2597_v26 = vmul.u32.u64.low %v2539_v7, %v730_v1  ;;  %v2598_v25 = vmul.u32.u64.high %v2539_v7, %v730_v1, %v2597_v26 }
  0xb3   :  { %v668_v14 = vsel %vm2551_vm6, 0, %v666_v27  ;;  %vm798_vm11 = vcmp.gt.s32.totalorder %v797_v18, 0  ;;  %v738_v3 = vmul.u32 %v2539_v7, %v722_v11  ;;  %vm570_vm13 = vcmp.lt.s32.totalorder %v2518_v61, 2 }
  0xb4   :  { %v658_v31 = vor.u32 4788187, %v657_v23  ;;  %v661_v24 = vcvt.s32.f32 %v654_v13  ;;  %v799_v55 = vsel %vm798_vm11, %v797_v18, 0  ;;  %vm571_vm14 = vcmp.eq.s32.totalorder %v2518_v61, 0 }
  0xb5   :  { %v741_v6 = vadd.s32 1, %v2593_v20  ;;  %v801_v40 = vand.u32 31, %v799_v55  ;;  %vm574_vm15 = vcmp.eq.s32.totalorder %v2518_v61, 2  ;;  %vm740_vm0 = vc.u32 %v2598_v25, %v2592_v49 }
  0xb6   :  { %v659_v42 = vand.u32 2147483647, %v658_v31  ;;  %v795_v44 = vor.u32 8388608, %v2543_v38  ;;  %v672_v48 = vadd.s32 3, %v668_v14  ;;  %v800_v10 = vshrl.u32 %v799_v55, 5 }
  0xb7   :  { %v1907_v46 = vpop.eup %1906  ;;  %v742_v7 = vsel %vm740_vm0, %v741_v6, %v2593_v20  ;;  %v802_v32 = vsub.s32 32, %v801_v40  ;;  %v804_v33 = vshll.u32 %v2003_v37, %v801_v40  ;;  %v807_v5 = vshll.u32 %v2004_v39, %v801_v40 }
  0xb8   :  { %v1909_v51 = vpop.eup %1908  ;;  %v575_v56 = vxor.u32 2147483648, %v1907_v46  ;;  %v662_v52 = vmul.f32 %v661_v24, %v659_v42  ;;  %v743_v34 = vadd.s32 %v742_v7, %v738_v3  ;;  %v810_v36 = vshll.u32 %v2005_v41, %v801_v40 }
  0xb9   :  { %v572_v50 = vxor.u32 2147483648, %v1909_v51  ;;  %v805_v21 = vshrl.u32 %v2004_v39, %v802_v32  ;;  %v808_v28 = vshrl.u32 %v2005_v41, %v802_v32  ;;  %v811_v9 = vshrl.u32 %v2006_v43, %v802_v32 }
  0xba   :  { %v576_v38 = vsel %vm574_vm15, %v575_v56, %v1909_v51  ;;  %v663_v8 = vxor.u32 2147483648, %v662_v52  ;;  %v744_v4 = vadd.s32 536870912, %v743_v34  ;;  %v813_v63 = vshll.u32 %v2006_v43, %v801_v40 }
  0xbb   :  { %v573_v54 = vsel %vm571_vm14, %v1907_v46, %v572_v50  ;;  %v806_v60 = vor.u32 %v805_v21, %v804_v33  ;;  %v809_v22 = vor.u32 %v808_v28, %v807_v5  ;;  %v814_v15 = vshrl.u32 %v2007_v45, %v802_v32 }
  0xbc   :  { %v577_v27 = vsel %vm570_vm13, %v573_v54, %v576_v38  ;;  %v664_v2 = vsel %vm581_vm4, %v663_v8, %v662_v52  ;;  %v2630_v19 = vshrl.u32 %v744_v4, 30  ;;  %v816_v59 = vshll.u32 %v2007_v45, %v801_v40 }
  0xbd   :  { %v578_v35 = vsel %vm567_vm10, nan, %v577_v27  ;;  %v667_v12 = vsel %vm2551_vm6, %v2147_v47, %v664_v2  ;;  %v817_v18 = vshrl.u32 %v2008_v53, %v802_v32  ;;  %v894_v11 = vand.u32 2139095040, %v2601_v30 }
  0xbe   :  { %1910 = vcosq.f32 %v667_v12  ;;  %v746_v61 = vshll.u32 %v2630_v19, 30  ;;  %1727 = vst [vmem:[#allocation6 + $0x20] sm:$0xff] %v578_v35  ;;  %v812_v1 = vor.u32 %v811_v9, %v810_v36  ;;  %v815_v16 = vor.u32 %v814_v15, %v813_v63  ;;  %v35_v35 = vld [vmem:[#allocation3 + $0x48] sm:$0xff] }
  0xbf   :  { %1912 = vsinq.f32 %v667_v12  ;;  %vm819_vm1 = vcmp.lt.s32.totalorder %v800_v10, 1  ;;  %v803_v57 = vshrl.u32 %v2003_v37, %v802_v32  ;;  %v818_v13 = vor.u32 %v817_v18, %v816_v59 }
  0xc0   :  { %v2642_v20 = vsub.s32 %v743_v34, %v746_v61  ;;  %vm821_vm2 = vcmp.lt.s32.totalorder %v800_v10, 3  ;;  %vm820_vm3 = vcmp.lt.s32.totalorder %v800_v10, 2  ;;  %vm822_vm4 = vcmp.lt.s32.totalorder %v800_v10, 4 }
  0xc1   :  { %v827_v23 = vsel %vm819_vm1, %v806_v60, %v809_v22  ;;  %v835_v26 = vshll.u32 %v795_v44, 8  ;;  %v673_v14 = vand.u32 3, %v672_v48  ;;  %v824_v24 = vsel %vm822_vm4, %v812_v1, 2102212464 }
  0xc2   :  { %v749_v31 = vsub.s32 0, %v2642_v20  ;;  %v828_v3 = vsel %vm822_vm4, %v815_v16, 920167782  ;;  %v832_v6 = vsel %vm822_vm4, %v818_v13, 1326507024  ;;  %v895_v40 = vshrl.u32 %v894_v11, 23 }
  0xc3   :  { %v829_v55 = vsel %vm821_vm2, %v812_v1, %v828_v3  ;;  %v823_v46 = vsel %vm819_vm1, %v803_v57, %v806_v60  ;;  %v831_v32 = vsel %vm819_vm1, %v809_v22, %v812_v1  ;;  %v825_v33 = vsel %vm821_vm2, %v809_v22, %v824_v24 }
  0xc4   :  { %v1779_v42 = vmin.u32 %v749_v31, %v2642_v20  ;;  %v830_v7 = vsel %vm820_vm3, %v827_v23, %v829_v55  ;;  %v833_v44 = vsel %vm821_vm2, %v815_v16, %v832_v6  ;;  %vm671_vm5 = vweird.f32 %v2147_v47 }
  0xc5   :  { %v2654_v48 = vmul.u32.u64.low %v835_v26, %v830_v7  ;;  %v2655_v51 = vmul.u32.u64.high %v835_v26, %v830_v7, %v2654_v48  ;;  %vm674_vm6 = vcmp.lt.s32.totalorder %v673_v14, 2  ;;  %vm675_vm7 = vcmp.eq.s32.totalorder %v673_v14, 0 }
  0xc6   :  { %v751_v56 = vclz %v1779_v42  ;;  %vm678_vm8 = vcmp.eq.s32.totalorder %v673_v14, 2  ;;  %v834_v52 = vsel %vm820_vm3, %v831_v32, %v833_v44  ;;  %v1786_v34 = vadd.s32 4294967169, %v895_v40  ;;  %v36_v40 = vld [vmem:[#allocation3 + $0x50] sm:$0xff] }
  0xc7   :  { %v826_v21 = vsel %vm820_vm3, %v823_v46, %v825_v33  ;;  %v2661_v28 = vmul.u32.u64.low %v835_v26, %v834_v52  ;;  %v2662_v38 = vmul.u32.u64.high %v835_v26, %v834_v52, %v2661_v28  ;;  %v739_v36 = vadd.s32 %v2592_v49, %v2598_v25 }
  0xc8   :  { %v1911_v5 = vpop.eup %1910  ;;  %v1780_v50 = vadd.s32 4294967294, %v751_v56  ;;  %v891_v54 = vand.u32 2147483647, %v2601_v30  ;;  %v901_v60 = vadd.s32 1, %v1786_v34  ;;  %v769_v63 = vsub.s32 4, %v2630_v19 }
  0xc9   :  { %v1913_v8 = vpop.eup %1912  ;;  %v679_v4 = vxor.u32 2147483648, %v1911_v5  ;;  %v845_v27 = vadd.s32 1, %v2655_v51  ;;  %v842_v22 = vmul.u32 %v835_v26, %v826_v21  ;;  %vm844_vm10 = vc.u32 %v2662_v38, %v2654_v48 }
  0xca   :  { %v676_v9 = vxor.u32 2147483648, %v1913_v8  ;;  %vm1781_vm9 = vcmp.lt.s32.totalorder %v1780_v50, 0  ;;  %vm902_vm12 = vcmp.gt.s32.totalorder %v901_v60, 0  ;;  %v898_v61 = vand.u32 8388607, %v891_v54 }
  0xcb   :  { %v680_v10 = vsel %vm678_vm8, %v679_v4, %v1913_v8  ;;  %v754_v2 = vsel %vm1781_vm9, 0, %v1780_v50  ;;  %v903_v18 = vsel %vm902_vm12, %v901_v60, 0  ;;  %v846_v57 = vsel %vm844_vm10, %v845_v27, %v2655_v51 }
  0xcc   :  { %v677_v12 = vsel %vm675_vm7, %v1911_v5, %v676_v9  ;;  %v755_v15 = vsub.s32 32, %v754_v2  ;;  %v756_v49 = vshll.u32 %v2642_v20, %v754_v2  ;;  %v759_v25 = vsub.s32 4294967266, %v754_v2 }
  0xcd   :  { %v681_v59 = vsel %vm674_vm6, %v677_v12, %v680_v10  ;;  %v2681_v13 = vmul.f32 %v2040_v0, %v35_v35  ;;  %vm685_vm11 = vcmp.lt.s32.totalorder %v2463_v58, 0  ;;  %v847_v20 = vadd.s32 %v846_v57, %v842_v22 }
  0xce   :  { %v682_v11 = vsel %vm671_vm5, nan, %v681_v59  ;;  %v757_v1 = vshrl.u32 %v739_v36, %v755_v15  ;;  %v760_v16 = vadd.s32 127, %v759_v25  ;;  %v905_v23 = vand.u32 31, %v903_v18 }
  0xcf   :  { %1728 = vst [vmem:[#allocation6 + $0x28] sm:$0xff] %v682_v11  ;;  %vm2686_vm13 = vcmp.le.f32.partialorder %v683_v29, 0.7853982  ;;  %v770_v31 = vsel %vm685_vm11, %v769_v63, %v2630_v19  ;;  %v848_v24 = vadd.s32 536870912, %v847_v20  ;;  %v899_v3 = vor.u32 8388608, %v898_v61 }
  0xd0   :  { %v758_v47 = vor.u32 %v757_v1, %v756_v49  ;;  %v761_v14 = vshll.u32 %v760_v16, 23  ;;  %v904_v55 = vshrl.u32 %v903_v18, 5  ;;  %v906_v6 = vsub.s32 32, %v905_v23 }
  0xd1   :  { %v908_v7 = vshll.u32 %v2003_v37, %v905_v23  ;;  %v917_v29 = vshll.u32 %v2006_v43, %v905_v23  ;;  %v849_v32 = vshrl.u32 %v848_v24, 30  ;;  %v911_v44 = vshll.u32 %v2004_v39, %v905_v23 }
  0xd2   :  { %v762_v42 = vor.u32 4788187, %v761_v14  ;;  %v765_v46 = vcvt.s32.f32 %v758_v47  ;;  %v909_v33 = vshrl.u32 %v2004_v39, %v906_v6  ;;  %v912_v51 = vshrl.u32 %v2005_v41, %v906_v6 }
  0xd3   :  { %v914_v19 = vshll.u32 %v2005_v41, %v905_v23  ;;  %v915_v52 = vshrl.u32 %v2006_v43, %v906_v6  ;;  %v918_v34 = vshrl.u32 %v2007_v45, %v906_v6  ;;  %v2702_v5 = vmul.f32 %v2040_v0, %v36_v40 }
  0xd4   :  { %v763_v56 = vand.u32 2147483647, %v762_v42  ;;  %v772_v50 = vsel %vm2686_vm13, 0, %v770_v31  ;;  %v850_v21 = vshll.u32 %v849_v32, 30  ;;  %v920_v28 = vshll.u32 %v2007_v45, %v905_v23 }
  0xd5   :  { %v907_v4 = vshrl.u32 %v2003_v37, %v906_v6  ;;  %v919_v36 = vor.u32 %v918_v34, %v917_v29  ;;  %v921_v60 = vshrl.u32 %v2008_v53, %v906_v6  ;;  %v910_v63 = vor.u32 %v909_v33, %v908_v7 }
  0xd6   :  { %v766_v8 = vmul.f32 %v765_v46, %v763_v56  ;;  %v2709_v9 = vsub.s32 %v847_v20, %v850_v21  ;;  %v913_v27 = vor.u32 %v912_v51, %v911_v44  ;;  %v2711_v10 = vshll.u32 %v899_v3, 8 }
  0xd7   :  { %v916_v22 = vor.u32 %v915_v52, %v914_v19  ;;  %vm923_vm14 = vcmp.lt.s32.totalorder %v904_v55, 1  ;;  %vm924_vm15 = vcmp.lt.s32.totalorder %v904_v55, 2  ;;  %v922_v12 = vor.u32 %v921_v60, %v920_v28 }
  0xd8   :  { %v767_v2 = vxor.u32 2147483648, %v766_v8  ;;  %v853_v35 = vsub.s32 0, %v2709_v9  ;;  %vm925_vm0 = vcmp.lt.s32.totalorder %v904_v55, 3  ;;  %vm926_vm1 = vcmp.lt.s32.totalorder %v904_v55, 4 }
  0xd9   :  { %v927_v49 = vsel %vm923_vm14, %v907_v4, %v910_v63  ;;  %v928_v25 = vsel %vm926_vm1, %v916_v22, 2102212464  ;;  %v932_v59 = vsel %vm926_vm1, %v919_v36, 920167782  ;;  %v931_v1 = vsel %vm923_vm14, %v910_v63, %v913_v27 }
  0xda   :  { %v768_v15 = vsel %vm685_vm11, %v767_v2, %v766_v8  ;;  %v1783_v18 = vmin.u32 %v853_v35, %v2709_v9  ;;  %v929_v11 = vsel %vm925_vm0, %v913_v27, %v928_v25  ;;  %v776_v16 = vadd.s32 3, %v772_v50 }
  0xdb   :  { %v771_v61 = vsel %vm2686_vm13, %v2463_v58, %v768_v15  ;;  %v933_v57 = vsel %vm925_vm0, %v916_v22, %v932_v59  ;;  %v998_v20 = vand.u32 2139095040, %v2681_v13  ;;  %vm789_vm2 = vcmp.lt.s32.totalorder %v2488_v17, 0 }
  0xdc   :  { %1914 = vcosq.f32 %v771_v61  ;;  %v855_v23 = vclz %v1783_v18  ;;  %v935_v47 = vsel %vm923_vm14, %v913_v27, %v916_v22  ;;  %v873_v26 = vsub.s32 4, %v849_v32 }
  0xdd   :  { %1916 = vsinq.f32 %v771_v61  ;;  %v930_v14 = vsel %vm924_vm15, %v927_v49, %v929_v11  ;;  %v934_v31 = vsel %vm924_vm15, %v931_v1, %v933_v57  ;;  %v936_v24 = vsel %vm926_vm1, %v922_v12, 1326507024 }
  0xde   :  { %v1784_v3 = vadd.s32 4294967294, %v855_v23  ;;  %v937_v6 = vsel %vm925_vm0, %v919_v36, %v936_v24  ;;  %v2734_v40 = vmul.u32.u64.low %v2711_v10, %v934_v31  ;;  %v2735_v42 = vmul.u32.u64.high %v2711_v10, %v934_v31, %v2734_v40 }
  0xdf   :  { %v777_v46 = vand.u32 3, %v776_v16  ;;  %vm2740_vm3 = vcmp.le.f32.partialorder %v787_v62, 0.7853982  ;;  %v938_v29 = vsel %vm924_vm15, %v935_v47, %v937_v6  ;;  %v999_v33 = vshrl.u32 %v998_v20, 23 }
  0xe0   :  { %vm775_vm4 = vweird.f32 %v2463_v58  ;;  %v843_v44 = vadd.s32 %v2654_v48, %v2662_v38  ;;  %vm1785_vm5 = vcmp.lt.s32.totalorder %v1784_v3, 0  ;;  %v874_v62 = vsel %vm789_vm2, %v873_v26, %v849_v32 }
  0xe1   :  { %v2749_v51 = vmul.u32.u64.low %v2711_v10, %v938_v29  ;;  %v2750_v56 = vmul.u32.u64.high %v2711_v10, %v938_v29, %v2749_v51  ;;  %v858_v19 = vsel %vm1785_vm5, 0, %v1784_v3  ;;  %v946_v52 = vmul.u32 %v2711_v10, %v930_v14 }
  0xe2   :  { %v1790_v34 = vadd.s32 4294967169, %v999_v33  ;;  %v859_v55 = vsub.s32 32, %v858_v19  ;;  %v860_v50 = vshll.u32 %v2709_v9, %v858_v19  ;;  %v863_v21 = vsub.s32 4294967266, %v858_v19 }
  0xe3   :  { %v949_v28 = vadd.s32 1, %v2735_v42  ;;  %vm778_vm6 = vcmp.lt.s32.totalorder %v777_v46, 2  ;;  %vm779_vm7 = vcmp.eq.s32.totalorder %v777_v46, 0  ;;  %v1102_v38 = vand.u32 2139095040, %v2702_v5 }
  0xe4   :  { %v1005_v48 = vadd.s32 1, %v1790_v34  ;;  %v861_v8 = vshrl.u32 %v843_v44, %v859_v55  ;;  %v864_v4 = vadd.s32 127, %v863_v21  ;;  %v876_v36 = vsel %vm2740_vm3, 0, %v874_v62 }
  0xe5   :  { %vm948_vm8 = vc.u32 %v2750_v56, %v2734_v40  ;;  %vm782_vm9 = vcmp.eq.s32.totalorder %v777_v46, 2  ;;  %v995_v9 = vand.u32 2147483647, %v2681_v13  ;;  %v880_v12 = vadd.s32 3, %v876_v36 }
  0xe6   :  { %v1915_v32 = vpop.eup %1914  ;;  %v950_v60 = vsel %vm948_vm8, %v949_v28, %v2735_v42  ;;  %vm1006_vm12 = vcmp.gt.s32.totalorder %v1005_v48, 0  ;;  %v862_v10 = vor.u32 %v861_v8, %v860_v50  ;;  %v865_v2 = vshll.u32 %v864_v4, 23 }
  0xe7   :  { %v1917_v63 = vpop.eup %1916  ;;  %v783_v27 = vxor.u32 2147483648, %v1915_v32  ;;  %v951_v22 = vadd.s32 %v950_v60, %v946_v52  ;;  %v1007_v15 = vsel %vm1006_vm12, %v1005_v48, 0  ;;  %v1103_v49 = vshrl.u32 %v1102_v38, 23 }
  0xe8   :  { %v780_v35 = vxor.u32 2147483648, %v1917_v63  ;;  %v866_v59 = vor.u32 4788187, %v865_v2  ;;  %v869_v61 = vcvt.s32.f32 %v862_v10  ;;  %v1009_v1 = vand.u32 31, %v1007_v15 }
  0xe9   :  { %v784_v25 = vsel %vm782_vm9, %v783_v27, %v1917_v63  ;;  %v952_v18 = vadd.s32 536870912, %v951_v22  ;;  %v1002_v23 = vand.u32 8388607, %v995_v9  ;;  %v1794_v31 = vadd.s32 4294967169, %v1103_v49 }
  0xea   :  { %v781_v11 = vsel %vm779_vm7, %v1915_v32, %v780_v35  ;;  %v867_v57 = vand.u32 2147483647, %v866_v59  ;;  %v1010_v26 = vsub.s32 32, %v1009_v1  ;;  %v1012_v14 = vshll.u32 %v2003_v37, %v1009_v1 }
  0xeb   :  { %v785_v16 = vsel %vm778_vm6, %v781_v11, %v784_v25  ;;  %v2766_v20 = vshrl.u32 %v952_v18, 30  ;;  %v2773_v3 = vand.u32 3, %v880_v12  ;;  %v1015_v42 = vshll.u32 %v2004_v39, %v1009_v1 }
  0xec   :  { %v786_v47 = vsel %vm775_vm4, nan, %v785_v16  ;;  %v870_v24 = vmul.f32 %v869_v61, %v867_v57  ;;  %v1013_v46 = vshrl.u32 %v2004_v39, %v1010_v26  ;;  %v1016_v29 = vshrl.u32 %v2005_v41, %v1010_v26 }
  0xed   :  { %v954_v6 = vshll.u32 %v2766_v20, 30  ;;  %1729 = vst [vmem:[#allocation6 + $0x30] sm:$0xff] %v786_v47  ;;  %v1018_v33 = vshll.u32 %v2005_v41, %v1009_v1  ;;  %v1019_v58 = vshrl.u32 %v2006_v43, %v1010_v26  ;;  %v1008_v19 = vshrl.u32 %v1007_v15, 5 }
  0xee   :  { %v871_v44 = vxor.u32 2147483648, %v870_v24  ;;  %v1021_v62 = vshll.u32 %v2006_v43, %v1009_v1  ;;  %v1003_v52 = vor.u32 8388608, %v1002_v23  ;;  %v1014_v34 = vor.u32 %v1013_v46, %v1012_v14 }
  0xef   :  { %v2781_v51 = vsub.s32 %v951_v22, %v954_v6  ;;  %v1099_v55 = vand.u32 2147483647, %v2702_v5  ;;  %v1109_v50 = vadd.s32 1, %v1794_v31  ;;  %v1017_v48 = vor.u32 %v1016_v29, %v1015_v42 }
  0xf0   :  { %v872_v21 = vsel %vm789_vm2, %v871_v44, %v870_v24  ;;  %v1022_v38 = vshrl.u32 %v2007_v45, %v1010_v26  ;;  %v1020_v4 = vor.u32 %v1019_v58, %v1018_v33  ;;  %v1024_v36 = vshll.u32 %v2007_v45, %v1009_v1 }
  0xf1   :  { %v957_v28 = vsub.s32 0, %v2781_v51  ;;  %v875_v8 = vsel %vm2740_vm3, %v2488_v17, %v872_v21  ;;  %v1025_v32 = vshrl.u32 %v2008_v53, %v1010_v26  ;;  %vm1027_vm10 = vcmp.lt.s32.totalorder %v1008_v19, 1 }
  0xf2   :  { %1918 = vcosq.f32 %v875_v8  ;;  %v1023_v63 = vor.u32 %v1022_v38, %v1021_v62  ;;  %v1011_v27 = vshrl.u32 %v2003_v37, %v1010_v26  ;;  %v1043_v2 = vshll.u32 %v1003_v52, 8 }
  0xf3   :  { %v1787_v60 = vmin.u32 %v957_v28, %v2781_v51  ;;  %1920 = vsinq.f32 %v875_v8  ;;  %v1026_v10 = vor.u32 %v1025_v32, %v1024_v36  ;;  %v947_v22 = vadd.s32 %v2734_v40, %v2750_v56 }
  0xf4   :  { %vm1029_vm11 = vcmp.lt.s32.totalorder %v1008_v19, 3  ;;  %v2800_v35 = vand.u32 8388607, %v1099_v55  ;;  %vm883_vm13 = vcmp.eq.s32.totalorder %v2773_v3, 0  ;;  %vm1028_vm14 = vcmp.lt.s32.totalorder %v1008_v19, 2 }
  0xf5   :  { %v959_v7 = vclz %v1787_v60  ;;  %vm1030_vm15 = vcmp.lt.s32.totalorder %v1008_v19, 4  ;;  %v1035_v12 = vsel %vm1027_vm10, %v1014_v34, %v1017_v48  ;;  %v1039_v15 = vsel %vm1027_vm10, %v1017_v48, %v1020_v4 }
  0xf6   :  { %vm882_vm0 = vcmp.lt.s32.totalorder %v2773_v3, 2  ;;  %v1032_v25 = vsel %vm1030_vm15, %v1020_v4, 2102212464  ;;  %v1036_v59 = vsel %vm1030_vm15, %v1023_v63, 920167782  ;;  %vm1110_vm1 = vcmp.gt.s32.totalorder %v1109_v50, 0 }
  0xf7   :  { %v1788_v49 = vadd.s32 4294967294, %v959_v7  ;;  %vm879_vm2 = vweird.f32 %v2488_v17  ;;  %v1031_v40 = vsel %vm1027_vm10, %v1011_v27, %v1014_v34  ;;  %v1033_v56 = vsel %vm1029_vm11, %v1017_v48, %v1032_v25 }
  0xf8   :  { %v1037_v61 = vsel %vm1029_vm11, %v1020_v4, %v1036_v59  ;;  %v1040_v18 = vsel %vm1030_vm15, %v1026_v10, 1326507024  ;;  %v1111_v16 = vsel %vm1110_vm1, %v1109_v50, 0  ;;  %vm893_vm4 = vcmp.lt.s32.totalorder %v2601_v30, 0 }
  0xf9   :  { %vm1789_vm3 = vcmp.lt.s32.totalorder %v1788_v49, 0  ;;  %v1038_v11 = vsel %vm1028_vm14, %v1035_v12, %v1037_v61  ;;  %v1041_v1 = vsel %vm1029_vm11, %v1023_v63, %v1040_v18  ;;  %v1034_v6 = vsel %vm1028_vm14, %v1031_v40, %v1033_v56 }
  0xfa   :  { %v962_v57 = vsel %vm1789_vm3, 0, %v1788_v49  ;;  %v1042_v23 = vsel %vm1028_vm14, %v1039_v15, %v1041_v1  ;;  %v2813_v47 = vmul.u32.u64.low %v1043_v2, %v1038_v11  ;;  %v2814_v26 = vmul.u32.u64.high %v1043_v2, %v1038_v11, %v2813_v47 }
  0xfb   :  { %v963_v14 = vsub.s32 32, %v962_v57  ;;  %v964_v31 = vshll.u32 %v2781_v51, %v962_v57  ;;  %v967_v24 = vsub.s32 4294967266, %v962_v57  ;;  %vm886_vm5 = vcmp.eq.s32.totalorder %v2773_v3, 2 }
  0xfc   :  { %v2821_v42 = vmul.u32.u64.low %v1043_v2, %v1042_v23  ;;  %v2822_v46 = vmul.u32.u64.high %v1043_v2, %v1042_v23, %v2821_v42  ;;  %v1113_v29 = vand.u32 31, %v1111_v16  ;;  %v1919_v33 = vpop.eup %1918  ;;  %v977_v62 = vsub.s32 4, %v2766_v20  ;;  %v37_v23 = vld [vmem:[#allocation3 + $0x58] sm:$0xff] }
  0xfd   :  { %v965_v58 = vshrl.u32 %v947_v22, %v963_v14  ;;  %v968_v44 = vadd.s32 127, %v967_v24  ;;  %v1107_v52 = vor.u32 8388608, %v2800_v35  ;;  %v1921_v34 = vpop.eup %1920  ;;  %v887_v50 = vxor.u32 2147483648, %v1919_v33 }
  0xfe   :  { %v1050_v21 = vmul.u32 %v1043_v2, %v1034_v6  ;;  %v1053_v51 = vadd.s32 1, %v2814_v26  ;;  %v1114_v19 = vsub.s32 32, %v1113_v29  ;;  %v884_v28 = vxor.u32 2147483648, %v1921_v34 }
  0xff   :  { %vm2829_vm6 = vcmp.le.f32.partialorder %v891_v54, 0.7853982  ;;  %v966_v38 = vor.u32 %v965_v58, %v964_v31  ;;  %v969_v8 = vshll.u32 %v968_v44, 23  ;;  %v2833_v4 = vshrl.u32 %v1111_v16, 5 }
 0x100   :  { %v888_v36 = vsel %vm886_vm5, %v887_v50, %v1921_v34  ;;  %vm1052_vm7 = vc.u32 %v2822_v46, %v2813_v47  ;;  %v1116_v32 = vshll.u32 %v2003_v37, %v1113_v29  ;;  %v1119_v60 = vshll.u32 %v2004_v39, %v1113_v29 }
 0x101   :  { %v885_v54 = vsel %vm883_vm13, %v1919_v33, %v884_v28  ;;  %v970_v63 = vor.u32 4788187, %v969_v8  ;;  %v973_v27 = vcvt.s32.f32 %v966_v38  ;;  %v1054_v10 = vsel %vm1052_vm7, %v1053_v51, %v2814_v26  ;;  %v38_v38 = vld [vmem:[#allocation3 + $0x60] sm:$0xff] }
 0x102   :  { %v889_v2 = vsel %vm882_vm0, %v885_v54, %v888_v36  ;;  %v1055_v22 = vadd.s32 %v1054_v10, %v1050_v21  ;;  %v1117_v7 = vshrl.u32 %v2004_v39, %v1114_v19  ;;  %v1120_v35 = vshrl.u32 %v2005_v41, %v1114_v19 }
 0x103   :  { %v890_v12 = vsel %vm879_vm2, nan, %v889_v2  ;;  %v971_v15 = vand.u32 2147483647, %v970_v63  ;;  %v1122_v49 = vshll.u32 %v2005_v41, %v1113_v29  ;;  %v1123_v25 = vshrl.u32 %v2006_v43, %v1114_v19 }
 0x104   :  { %v978_v59 = vsel %vm893_vm4, %v977_v62, %v2766_v20  ;;  %v1056_v40 = vadd.s32 536870912, %v1055_v22  ;;  %v1118_v3 = vor.u32 %v1117_v7, %v1116_v32  ;;  %v1125_v56 = vshll.u32 %v2006_v43, %v1113_v29  ;;  %1730 = vst [vmem:[#allocation6 + $0x38] sm:$0xff] %v890_v12 }
 0x105   :  { %v974_v61 = vmul.f32 %v973_v27, %v971_v15  ;;  %v1121_v18 = vor.u32 %v1120_v35, %v1119_v60  ;;  %v1126_v11 = vshrl.u32 %v2007_v45, %v1114_v19  ;;  %v1128_v17 = vshll.u32 %v2007_v45, %v1113_v29 }
 0x106   :  { %v1057_v1 = vshrl.u32 %v1056_v40, 30  ;;  %v1129_v16 = vshrl.u32 %v2008_v53, %v1114_v19  ;;  %vm1131_vm8 = vcmp.lt.s32.totalorder %v2833_v4, 1  ;;  %v2860_v57 = vshll.u32 %v1107_v52, 8 }
 0x107   :  { %v975_v20 = vxor.u32 2147483648, %v974_v61  ;;  %v1124_v26 = vor.u32 %v1123_v25, %v1122_v49  ;;  %v1127_v14 = vor.u32 %v1126_v11, %v1125_v56  ;;  %vm1134_vm9 = vcmp.lt.s32.totalorder %v2833_v4, 4 }
 0x108   :  { %v980_v31 = vsel %vm2829_vm6, 0, %v978_v59  ;;  %v1058_v24 = vshll.u32 %v1057_v1, 30  ;;  %vm1132_vm12 = vcmp.lt.s32.totalorder %v2833_v4, 2  ;;  %vm1133_vm10 = vcmp.lt.s32.totalorder %v2833_v4, 3 }
 0x109   :  { %v976_v6 = vsel %vm893_vm4, %v975_v20, %v974_v61  ;;  %v1130_v42 = vor.u32 %v1129_v16, %v1128_v17  ;;  %v1139_v29 = vsel %vm1131_vm8, %v1118_v3, %v1121_v18  ;;  %v1140_v33 = vsel %vm1134_vm9, %v1127_v14, 920167782 }
 0x10a   :  { %v2874_v58 = vmul.f32 %v2040_v0, %v37_v23  ;;  %v979_v44 = vsel %vm2829_vm6, %v2601_v30, %v976_v6  ;;  %v2879_v62 = vsub.s32 %v1055_v22, %v1058_v24  ;;  %v1115_v52 = vshrl.u32 %v2003_v37, %v1114_v19 }
 0x10b   :  { %1922 = vcosq.f32 %v979_v44  ;;  %v984_v34 = vadd.s32 3, %v980_v31  ;;  %v1136_v50 = vsel %vm1134_vm9, %v1124_v26, 2102212464  ;;  %v1141_v21 = vsel %vm1133_vm10, %v1124_v26, %v1140_v33 }
 0x10c   :  { %1924 = vsinq.f32 %v979_v44  ;;  %v1061_v51 = vsub.s32 0, %v2879_v62  ;;  %v1081_v28 = vsub.s32 4, %v1057_v1  ;;  %v1142_v48 = vsel %vm1132_vm12, %v1139_v29, %v1141_v21 }
 0x10d   :  { %v1143_v8 = vsel %vm1131_vm8, %v1121_v18, %v1124_v26  ;;  %v1144_v19 = vsel %vm1134_vm9, %v1130_v42, 1326507024  ;;  %v2894_v36 = vmul.u32.u64.low %v2860_v57, %v1142_v48  ;;  %v2895_v32 = vmul.u32.u64.high %v2860_v57, %v1142_v48, %v2894_v36 }
 0x10e   :  { %v1791_v60 = vmin.u32 %v1061_v51, %v2879_v62  ;;  %v1135_v54 = vsel %vm1131_vm8, %v1115_v52, %v1118_v3  ;;  %v1137_v63 = vsel %vm1133_vm10, %v1121_v18, %v1136_v50  ;;  %v1145_v27 = vsel %vm1133_vm10, %v1127_v14, %v1144_v19 }
 0x10f   :  { %v985_v10 = vand.u32 3, %v984_v34  ;;  %v1146_v2 = vsel %vm1132_vm12, %v1143_v8, %v1145_v27  ;;  %v1206_v22 = vand.u32 2139095040, %v2874_v58  ;;  %v2909_v7 = vmul.f32 %v2040_v0, %v38_v38 }
 0x110   :  { %vm983_vm11 = vweird.f32 %v2601_v30  ;;  %vm997_vm13 = vcmp.lt.s32.totalorder %v2681_v13, 0  ;;  %v1063_v35 = vclz %v1791_v60  ;;  %v1138_v12 = vsel %vm1132_vm12, %v1135_v54, %v1137_v63 }
 0x111   :  { %v2916_v15 = vmul.u32.u64.low %v2860_v57, %v1146_v2  ;;  %v2917_v49 = vmul.u32.u64.high %v2860_v57, %v1146_v2, %v2916_v15  ;;  %v1207_v25 = vshrl.u32 %v1206_v22, 23  ;;  %vm2921_vm14 = vcmp.le.f32.partialorder %v995_v9, 0.7853982 }
 0x112   :  { %v1792_v40 = vadd.s32 4294967294, %v1063_v35  ;;  %v1082_v3 = vsel %vm997_vm13, %v1081_v28, %v1057_v1  ;;  %v1203_v56 = vand.u32 2147483647, %v2874_v58  ;;  %vm986_vm15 = vcmp.lt.s32.totalorder %v985_v10, 2 }
 0x113   :  { %vm987_vm0 = vcmp.eq.s32.totalorder %v985_v10, 0  ;;  %v1157_v4 = vadd.s32 1, %v2895_v32  ;;  %v1798_v61 = vadd.s32 4294967169, %v1207_v25  ;;  %vm990_vm1 = vcmp.eq.s32.totalorder %v985_v10, 2 }
 0x114   :  { %v1051_v18 = vadd.s32 %v2813_v47, %v2822_v46  ;;  %vm1793_vm2 = vcmp.lt.s32.totalorder %v1792_v40, 0  ;;  %v1154_v9 = vmul.u32 %v2860_v57, %v1138_v12  ;;  %v1084_v16 = vsel %vm2921_vm14, 0, %v1082_v3 }
 0x115   :  { %v1923_v11 = vpop.eup %1922  ;;  %v1066_v17 = vsel %vm1793_vm2, 0, %v1792_v40  ;;  %vm1156_vm3 = vc.u32 %v2917_v49, %v2894_v36  ;;  %v1213_v1 = vadd.s32 1, %v1798_v61  ;;  %v1210_v46 = vand.u32 8388607, %v1203_v56 }
 0x116   :  { %v1925_v23 = vpop.eup %1924  ;;  %v991_v20 = vxor.u32 2147483648, %v1923_v11  ;;  %v1067_v26 = vsub.s32 32, %v1066_v17  ;;  %v1068_v14 = vshll.u32 %v2879_v62, %v1066_v17  ;;  %v1071_v31 = vsub.s32 4294967266, %v1066_v17 }
 0x117   :  { %v988_v24 = vxor.u32 2147483648, %v1925_v23  ;;  %v1158_v47 = vsel %vm1156_vm3, %v1157_v4, %v2895_v32  ;;  %vm1214_vm4 = vcmp.gt.s32.totalorder %v1213_v1, 0  ;;  %v1310_v52 = vand.u32 2139095040, %v2909_v7 }
 0x118   :  { %v992_v57 = vsel %vm990_vm1, %v991_v20, %v1925_v23  ;;  %v1069_v6 = vshrl.u32 %v1051_v18, %v1067_v26  ;;  %v1072_v42 = vadd.s32 127, %v1071_v31  ;;  %v1159_v29 = vadd.s32 %v1158_v47, %v1154_v9 }
 0x119   :  { %v989_v33 = vsel %vm987_vm0, %v1923_v11, %v988_v24  ;;  %v1215_v44 = vsel %vm1214_vm4, %v1213_v1, 0  ;;  %v1088_v28 = vadd.s32 3, %v1084_v16  ;;  %v1211_v32 = vor.u32 8388608, %v1210_v46 }
 0x11a   :  { %v993_v62 = vsel %vm986_vm15, %v989_v33, %v992_v57  ;;  %v1070_v34 = vor.u32 %v1069_v6, %v1068_v14  ;;  %v1073_v50 = vshll.u32 %v1072_v42, 23  ;;  %v1160_v21 = vadd.s32 536870912, %v1159_v29 }
 0x11b   :  { %v994_v51 = vsel %vm983_vm11, nan, %v993_v62  ;;  %v1217_v48 = vand.u32 31, %v1215_v44  ;;  %v1216_v60 = vshrl.u32 %v1215_v44, 5  ;;  %v1307_v63 = vand.u32 2147483647, %v2909_v7 }
 0x11c   :  { %v1074_v38 = vor.u32 4788187, %v1073_v50  ;;  %v1077_v8 = vcvt.s32.f32 %v1070_v34  ;;  %v2946_v19 = vshrl.u32 %v1160_v21, 30  ;;  %1731 = vst [vmem:[#allocation6 + $0x40] sm:$0xff] %v994_v51  ;;  %v1311_v27 = vshrl.u32 %v1310_v52, 23 }
 0x11d   :  { %v1218_v54 = vsub.s32 32, %v1217_v48  ;;  %v1220_v22 = vshll.u32 %v2003_v37, %v1217_v48  ;;  %v1223_v30 = vshll.u32 %v2004_v39, %v1217_v48  ;;  %v1226_v15 = vshll.u32 %v2005_v41, %v1217_v48 }
 0x11e   :  { %v1075_v10 = vand.u32 2147483647, %v1074_v38  ;;  %v1162_v2 = vshll.u32 %v2946_v19, 30  ;;  %v1229_v4 = vshll.u32 %v2006_v43, %v1217_v48  ;;  %v2960_v18 = vand.u32 3, %v1088_v28 }
 0x11f   :  { %v1221_v35 = vshrl.u32 %v2004_v39, %v1218_v54  ;;  %v1224_v12 = vshrl.u32 %v2005_v41, %v1218_v54  ;;  %v1227_v25 = vshrl.u32 %v2006_v43, %v1218_v54  ;;  %v1230_v61 = vshrl.u32 %v2007_v45, %v1218_v54 }
 0x120   :  { %v1078_v40 = vmul.f32 %v1077_v8, %v1075_v10  ;;  %v2956_v3 = vsub.s32 %v1159_v29, %v1162_v2  ;;  %v2962_v9 = vshll.u32 %v1211_v32, 8  ;;  %v1802_v11 = vadd.s32 4294967169, %v1311_v27 }
 0x121   :  { %v2966_v17 = vand.u32 8388607, %v1307_v63  ;;  %v1219_v23 = vshrl.u32 %v2003_v37, %v1218_v54  ;;  %v1222_v20 = vor.u32 %v1221_v35, %v1220_v22  ;;  %v1225_v26 = vor.u32 %v1224_v12, %v1223_v30 }
 0x122   :  { %v1079_v16 = vxor.u32 2147483648, %v1078_v40  ;;  %v1165_v1 = vsub.s32 0, %v2956_v3  ;;  %v1228_v14 = vor.u32 %v1227_v25, %v1226_v15  ;;  %v1232_v31 = vshll.u32 %v2007_v45, %v1217_v48 }
 0x123   :  { %v1233_v24 = vshrl.u32 %v2008_v53, %v1218_v54  ;;  %v1231_v57 = vor.u32 %v1230_v61, %v1229_v4  ;;  %vm1235_vm5 = vcmp.lt.s32.totalorder %v1216_v60, 1  ;;  %vm1238_vm6 = vcmp.lt.s32.totalorder %v1216_v60, 4 }
 0x124   :  { %v1080_v47 = vsel %vm997_vm13, %v1079_v16, %v1078_v40  ;;  %v1795_v46 = vmin.u32 %v1165_v1, %v2956_v3  ;;  %v1317_v29 = vadd.s32 1, %v1802_v11  ;;  %vm1236_vm7 = vcmp.lt.s32.totalorder %v1216_v60, 2 }
 0x125   :  { %v1083_v6 = vsel %vm2921_vm14, %v2681_v13, %v1080_v47  ;;  %v1234_v42 = vor.u32 %v1233_v24, %v1232_v31  ;;  %vm1237_vm8 = vcmp.lt.s32.totalorder %v1216_v60, 3  ;;  %v1239_v44 = vsel %vm1235_vm5, %v1219_v23, %v1222_v20 }
 0x126   :  { %1926 = vcosq.f32 %v1083_v6  ;;  %v1167_v33 = vclz %v1795_v46  ;;  %v1240_v52 = vsel %vm1238_vm6, %v1228_v14, 2102212464  ;;  %v1243_v62 = vsel %vm1235_vm5, %v1222_v20, %v1225_v26 }
 0x127   :  { %1928 = vsinq.f32 %v1083_v6  ;;  %v1241_v50 = vsel %vm1237_vm8, %v1225_v26, %v1240_v52  ;;  %v1244_v59 = vsel %vm1238_vm6, %v1231_v57, 920167782  ;;  %v1247_v21 = vsel %vm1235_vm5, %v1225_v26, %v1228_v14 }
 0x128   :  { %v1796_v34 = vadd.s32 4294967294, %v1167_v33  ;;  %vm1091_vm9 = vcmp.eq.s32.totalorder %v2960_v18, 0  ;;  %v1155_v51 = vadd.s32 %v2894_v36, %v2917_v49  ;;  %v1245_v28 = vsel %vm1237_vm8, %v1228_v14, %v1244_v59 }
 0x129   :  { %v1248_v48 = vsel %vm1238_vm6, %v1234_v42, 1326507024  ;;  %vm1318_vm12 = vcmp.gt.s32.totalorder %v1317_v29, 0  ;;  %vm1090_vm10 = vcmp.lt.s32.totalorder %v2960_v18, 2  ;;  %v1242_v38 = vsel %vm1236_vm7, %v1239_v44, %v1241_v50 }
 0x12a   :  { %vm1797_vm11 = vcmp.lt.s32.totalorder %v1796_v34, 0  ;;  %v1246_v8 = vsel %vm1236_vm7, %v1243_v62, %v1245_v28  ;;  %v1249_v32 = vsel %vm1237_vm8, %v1231_v57, %v1248_v48  ;;  %vm1087_vm13 = vweird.f32 %v2681_v13 }
 0x12b   :  { %v1170_v54 = vsel %vm1797_vm11, 0, %v1796_v34  ;;  %v1250_v27 = vsel %vm1236_vm7, %v1247_v21, %v1249_v32  ;;  %v2996_v36 = vmul.u32.u64.low %v2962_v9, %v1246_v8  ;;  %v2997_v49 = vmul.u32.u64.high %v2962_v9, %v1246_v8, %v2996_v36 }
 0x12c   :  { %vm1101_vm14 = vcmp.lt.s32.totalorder %v2702_v5, 0  ;;  %v1171_v10 = vsub.s32 32, %v1170_v54  ;;  %v1172_v2 = vshll.u32 %v2956_v3, %v1170_v54  ;;  %v1175_v22 = vsub.s32 4294967266, %v1170_v54 }
 0x12d   :  { %v1319_v30 = vsel %vm1318_vm12, %v1317_v29, 0  ;;  %vm1094_vm15 = vcmp.eq.s32.totalorder %v2960_v18, 2  ;;  %v3004_v35 = vmul.u32.u64.low %v2962_v9, %v1250_v27  ;;  %v3005_v12 = vmul.u32.u64.high %v2962_v9, %v1250_v27, %v3004_v35  ;;  %v39_v18 = vld [vmem:[#allocation3 + $0x68] sm:$0xff] }
 0x12e   :  { %v1321_v60 = vand.u32 31, %v1319_v30  ;;  %v1173_v15 = vshrl.u32 %v1155_v51, %v1171_v10  ;;  %v1176_v25 = vadd.s32 127, %v1175_v22  ;;  %v1185_v40 = vsub.s32 4, %v2946_v19 }
 0x12f   :  { %v1315_v4 = vor.u32 8388608, %v2966_v17  ;;  %v1258_v61 = vmul.u32 %v2962_v9, %v1242_v38  ;;  %v1261_v11 = vadd.s32 1, %v2997_v49  ;;  %v3011_v3 = vshrl.u32 %v1319_v30, 5 }
 0x130   :  { %v1322_v16 = vsub.s32 32, %v1321_v60  ;;  %v1927_v1 = vpop.eup %1926  ;;  %vm3015_vm0 = vcmp.le.f32.partialorder %v1099_v55, 0.7853982  ;;  %v1174_v20 = vor.u32 %v1173_v15, %v1172_v2  ;;  %v1177_v26 = vshll.u32 %v1176_v25, 23 }
 0x131   :  { %v1324_v14 = vshll.u32 %v2003_v37, %v1321_v60  ;;  %v1327_v17 = vshll.u32 %v2004_v39, %v1321_v60  ;;  %v1929_v31 = vpop.eup %1928  ;;  %v1095_v9 = vxor.u32 2147483648, %v1927_v1  ;;  %vm1260_vm1 = vc.u32 %v3005_v12, %v2996_v36 }
 0x132   :  { %v1330_v24 = vshll.u32 %v2005_v41, %v1321_v60  ;;  %v1333_v47 = vshll.u32 %v2006_v43, %v1321_v60  ;;  %v1092_v46 = vxor.u32 2147483648, %v1929_v31  ;;  %v1178_v55 = vor.u32 4788187, %v1177_v26 }
 0x133   :  { %v1181_v57 = vcvt.s32.f32 %v1174_v20  ;;  %v1262_v6 = vsel %vm1260_vm1, %v1261_v11, %v2997_v49  ;;  %v1096_v42 = vsel %vm1094_vm15, %v1095_v9, %v1929_v31  ;;  %v1325_v33 = vshrl.u32 %v2004_v39, %v1322_v16 }
 0x134   :  { %v1263_v29 = vadd.s32 %v1262_v6, %v1258_v61  ;;  %v1328_v44 = vshrl.u32 %v2005_v41, %v1322_v16  ;;  %v1093_v52 = vsel %vm1091_vm9, %v1927_v1, %v1092_v46  ;;  %v1179_v62 = vand.u32 2147483647, %v1178_v55 }
 0x135   :  { %v1331_v34 = vshrl.u32 %v2006_v43, %v1322_v16  ;;  %v1334_v50 = vshrl.u32 %v2007_v45, %v1322_v16  ;;  %v1097_v59 = vsel %vm1090_vm10, %v1093_v52, %v1096_v42  ;;  %v1186_v21 = vsel %vm1101_vm14, %v1185_v40, %v2946_v19 }
 0x136   :  { %v1264_v51 = vadd.s32 536870912, %v1263_v29  ;;  %v1326_v28 = vor.u32 %v1325_v33, %v1324_v14  ;;  %v1098_v48 = vsel %vm1087_vm13, nan, %v1097_v59  ;;  %v1182_v38 = vmul.f32 %v1181_v57, %v1179_v62 }
 0x137   :  { %v1329_v8 = vor.u32 %v1328_v44, %v1327_v17  ;;  %v1335_v32 = vor.u32 %v1334_v50, %v1333_v47  ;;  %v1336_v27 = vshll.u32 %v2007_v45, %v1321_v60  ;;  %v1337_v49 = vshrl.u32 %v2008_v53, %v1322_v16  ;;  %1732 = vst [vmem:[#allocation6 + $0x48] sm:$0xff] %v1098_v48  ;;  %v40_v17 = vld [vmem:[#allocation3 + $0x70] sm:$0xff] }
 0x138   :  { %v1265_v54 = vshrl.u32 %v1264_v51, 30  ;;  %vm1339_vm2 = vcmp.lt.s32.totalorder %v3011_v3, 1  ;;  %v1183_v10 = vxor.u32 2147483648, %v1182_v38  ;;  %v1332_v2 = vor.u32 %v1331_v34, %v1330_v24 }
 0x139   :  { %vm1342_vm3 = vcmp.lt.s32.totalorder %v3011_v3, 4  ;;  %v3045_v19 = vshll.u32 %v1315_v4, 8  ;;  %v1188_v13 = vsel %vm3015_vm0, 0, %v1186_v21  ;;  %vm1340_vm4 = vcmp.lt.s32.totalorder %v3011_v3, 2 }
 0x13a   :  { %v1266_v22 = vshll.u32 %v1265_v54, 30  ;;  %vm1341_vm5 = vcmp.lt.s32.totalorder %v3011_v3, 3  ;;  %v1184_v30 = vsel %vm1101_vm14, %v1183_v10, %v1182_v38  ;;  %v1338_v35 = vor.u32 %v1337_v49, %v1336_v27 }
 0x13b   :  { %v1347_v60 = vsel %vm1339_vm2, %v1326_v28, %v1329_v8  ;;  %v1348_v15 = vsel %vm1342_vm3, %v1335_v32, 920167782  ;;  %v3058_v25 = vmul.f32 %v2040_v0, %v39_v18  ;;  %v1187_v40 = vsel %vm3015_vm0, %v2702_v5, %v1184_v30 }
 0x13c   :  { %v3063_v4 = vsub.s32 %v1263_v29, %v1266_v22  ;;  %v1323_v61 = vshrl.u32 %v2003_v37, %v1322_v16  ;;  %1930 = vcosq.f32 %v1187_v40  ;;  %v1192_v11 = vadd.s32 3, %v1188_v13 }
 0x13d   :  { %v1344_v1 = vsel %vm1342_vm3, %v1332_v2, 2102212464  ;;  %v1349_v20 = vsel %vm1341_vm5, %v1332_v2, %v1348_v15  ;;  %1932 = vsinq.f32 %v1187_v40  ;;  %v1289_v14 = vsub.s32 4, %v1265_v54 }
 0x13e   :  { %v1269_v26 = vsub.s32 0, %v3063_v4  ;;  %v1350_v23 = vsel %vm1340_vm4, %v1347_v60, %v1349_v20  ;;  %v1351_v31 = vsel %vm1339_vm2, %v1329_v8, %v1332_v2  ;;  %v1352_v16 = vsel %vm1342_vm3, %v1338_v35, 1326507024 }
 0x13f   :  { %v3078_v9 = vmul.u32.u64.low %v3045_v19, %v1350_v23  ;;  %v3079_v24 = vmul.u32.u64.high %v3045_v19, %v1350_v23, %v3078_v9  ;;  %v1343_v46 = vsel %vm1339_vm2, %v1323_v61, %v1326_v28  ;;  %v1345_v55 = vsel %vm1341_vm5, %v1329_v8, %v1344_v1 }
 0x140   :  { %v1799_v47 = vmin.u32 %v1269_v26, %v3063_v4  ;;  %v1353_v57 = vsel %vm1341_vm5, %v1335_v32, %v1352_v16  ;;  %v1193_v6 = vand.u32 3, %v1192_v11  ;;  %v1414_v29 = vand.u32 2139095040, %v3058_v25 }
 0x141   :  { %v1354_v42 = vsel %vm1340_vm4, %v1351_v31, %v1353_v57  ;;  %v3093_v33 = vmul.f32 %v2040_v0, %v40_v17  ;;  %vm1191_vm6 = vweird.f32 %v2702_v5  ;;  %vm1205_vm7 = vcmp.lt.s32.totalorder %v2874_v58, 0 }
 0x142   :  { %v1271_v44 = vclz %v1799_v47  ;;  %v1346_v52 = vsel %vm1340_vm4, %v1343_v46, %v1345_v55  ;;  %v3100_v62 = vmul.u32.u64.low %v3045_v19, %v1354_v42  ;;  %v3101_v34 = vmul.u32.u64.high %v3045_v19, %v1354_v42, %v3100_v62 }
 0x143   :  { %v1415_v50 = vshrl.u32 %v1414_v29, 23  ;;  %vm3105_vm8 = vcmp.le.f32.partialorder %v1203_v56, 0.7853982  ;;  %v1290_v51 = vsel %vm1205_vm7, %v1289_v14, %v1265_v54  ;;  %v1411_v28 = vand.u32 2147483647, %v3058_v25 }
 0x144   :  { %v1800_v21 = vadd.s32 4294967294, %v1271_v44  ;;  %vm1194_vm9 = vcmp.lt.s32.totalorder %v1193_v6, 2  ;;  %vm1195_vm12 = vcmp.eq.s32.totalorder %v1193_v6, 0  ;;  %v1365_v3 = vadd.s32 1, %v3079_v24 }
 0x145   :  { %v1806_v48 = vadd.s32 4294967169, %v1415_v50  ;;  %vm1198_vm10 = vcmp.eq.s32.totalorder %v1193_v6, 2  ;;  %v1259_v38 = vadd.s32 %v2996_v36, %v3005_v12  ;;  %v1362_v56 = vmul.u32 %v3045_v19, %v1346_v52 }
 0x146   :  { %vm1801_vm11 = vcmp.lt.s32.totalorder %v1800_v21, 0  ;;  %v1931_v8 = vpop.eup %1930  ;;  %v1292_v27 = vsel %vm3105_vm8, 0, %v1290_v51  ;;  %vm1364_vm13 = vc.u32 %v3101_v34, %v3078_v9  ;;  %v1418_v12 = vand.u32 8388607, %v1411_v28 }
 0x147   :  { %v1274_v32 = vsel %vm1801_vm11, 0, %v1800_v21  ;;  %v1421_v54 = vadd.s32 1, %v1806_v48  ;;  %v1933_v49 = vpop.eup %1932  ;;  %v1199_v18 = vxor.u32 2147483648, %v1931_v8  ;;  %v1366_v36 = vsel %vm1364_vm13, %v1365_v3, %v3079_v24 }
 0x148   :  { %v1275_v10 = vsub.s32 32, %v1274_v32  ;;  %v1276_v2 = vshll.u32 %v3063_v4, %v1274_v32  ;;  %v1279_v13 = vsub.s32 4294967266, %v1274_v32  ;;  %v1196_v22 = vxor.u32 2147483648, %v1933_v49 }
 0x149   :  { %vm1422_vm14 = vcmp.gt.s32.totalorder %v1421_v54, 0  ;;  %v1200_v19 = vsel %vm1198_vm10, %v1199_v18, %v1933_v49  ;;  %v1367_v60 = vadd.s32 %v1366_v36, %v1362_v56  ;;  %v1518_v61 = vand.u32 2139095040, %v3093_v33 }
 0x14a   :  { %v1277_v30 = vshrl.u32 %v1259_v38, %v1275_v10  ;;  %v1280_v35 = vadd.s32 127, %v1279_v13  ;;  %v1197_v15 = vsel %vm1195_vm12, %v1931_v8, %v1196_v22  ;;  %v1423_v40 = vsel %vm1422_vm14, %v1421_v54, 0 }
 0x14b   :  { %v1201_v4 = vsel %vm1194_vm9, %v1197_v15, %v1200_v19  ;;  %v1368_v20 = vadd.s32 536870912, %v1367_v60  ;;  %v1296_v14 = vadd.s32 3, %v1292_v27  ;;  %v1425_v23 = vand.u32 31, %v1423_v40 }
 0x14c   :  { %v1278_v11 = vor.u32 %v1277_v30, %v1276_v2  ;;  %v1281_v1 = vshll.u32 %v1280_v35, 23  ;;  %v1202_v26 = vsel %vm1191_vm6, nan, %v1201_v4  ;;  %v1419_v24 = vor.u32 8388608, %v1418_v12 }
 0x14d   :  { %v3130_v16 = vshrl.u32 %v1368_v20, 30  ;;  %1733 = vst [vmem:[#allocation6 + $0x50] sm:$0xff] %v1202_v26  ;;  %v1424_v47 = vshrl.u32 %v1423_v40, 5  ;;  %v1426_v46 = vsub.s32 32, %v1425_v23  ;;  %v1515_v55 = vand.u32 2147483647, %v3093_v33 }
 0x14e   :  { %v1282_v17 = vor.u32 4788187, %v1281_v1  ;;  %v1285_v31 = vcvt.s32.f32 %v1278_v11  ;;  %v1519_v57 = vshrl.u32 %v1518_v61, 23  ;;  %v1428_v29 = vshll.u32 %v2003_v37, %v1425_v23 }
 0x14f   :  { %v1370_v42 = vshll.u32 %v3130_v16, 30  ;;  %v1431_v5 = vshll.u32 %v2004_v39, %v1425_v23  ;;  %v1429_v44 = vshrl.u32 %v2004_v39, %v1426_v46  ;;  %v1432_v52 = vshrl.u32 %v2005_v41, %v1426_v46 }
 0x150   :  { %v1283_v6 = vand.u32 2147483647, %v1282_v17  ;;  %v1434_v62 = vshll.u32 %v2005_v41, %v1425_v23  ;;  %v1435_v50 = vshrl.u32 %v2006_v43, %v1426_v46  ;;  %v1437_v3 = vshll.u32 %v2006_v43, %v1425_v23 }
 0x151   :  { %v3140_v51 = vsub.s32 %v1367_v60, %v1370_v42  ;;  %v1438_v48 = vshrl.u32 %v2007_v45, %v1426_v46  ;;  %v3144_v38 = vand.u32 3, %v1296_v14  ;;  %v3146_v56 = vshll.u32 %v1419_v24, 8 }
 0x152   :  { %v1286_v21 = vmul.f32 %v1285_v31, %v1283_v6  ;;  %v1810_v8 = vadd.s32 4294967169, %v1519_v57  ;;  %v3150_v32 = vand.u32 8388607, %v1515_v55  ;;  %v1427_v49 = vshrl.u32 %v2003_v37, %v1426_v46 }
 0x153   :  { %v1373_v54 = vsub.s32 0, %v3140_v51  ;;  %v1430_v18 = vor.u32 %v1429_v44, %v1428_v29  ;;  %v1433_v10 = vor.u32 %v1432_v52, %v1431_v5  ;;  %v1436_v2 = vor.u32 %v1435_v50, %v1434_v62 }
 0x154   :  { %v1287_v27 = vxor.u32 2147483648, %v1286_v21  ;;  %v1440_v13 = vshll.u32 %v2007_v45, %v1425_v23  ;;  %v1441_v22 = vshrl.u32 %v2008_v53, %v1426_v46  ;;  %v1439_v19 = vor.u32 %v1438_v48, %v1437_v3 }
 0x155   :  { %v1803_v12 = vmin.u32 %v1373_v54, %v3140_v51  ;;  %vm1443_vm15 = vcmp.lt.s32.totalorder %v1424_v47, 1  ;;  %vm1446_vm0 = vcmp.lt.s32.totalorder %v1424_v47, 4  ;;  %v1525_v60 = vadd.s32 1, %v1810_v8 }
 0x156   :  { %v1288_v36 = vsel %vm1205_vm7, %v1287_v27, %v1286_v21  ;;  %v1442_v35 = vor.u32 %v1441_v22, %v1440_v13  ;;  %vm1444_vm1 = vcmp.lt.s32.totalorder %v1424_v47, 2  ;;  %vm1445_vm2 = vcmp.lt.s32.totalorder %v1424_v47, 3 }
 0x157   :  { %v1291_v30 = vsel %vm3105_vm8, %v2874_v58, %v1288_v36  ;;  %v1375_v15 = vclz %v1803_v12  ;;  %v1447_v40 = vsel %vm1443_vm15, %v1427_v49, %v1430_v18  ;;  %v1448_v61 = vsel %vm1446_vm0, %v1436_v2, 2102212464 }
 0x158   :  { %1934 = vcosq.f32 %v1291_v30  ;;  %v1451_v4 = vsel %vm1443_vm15, %v1430_v18, %v1433_v10  ;;  %v1449_v1 = vsel %vm1445_vm2, %v1433_v10, %v1448_v61  ;;  %v1452_v59 = vsel %vm1446_vm0, %v1439_v19, 920167782 }
 0x159   :  { %1936 = vsinq.f32 %v1291_v30  ;;  %v1804_v11 = vadd.s32 4294967294, %v1375_v15  ;;  %v1455_v20 = vsel %vm1443_vm15, %v1433_v10, %v1436_v2  ;;  %vm1299_vm3 = vcmp.eq.s32.totalorder %v3144_v38, 0 }
 0x15a   :  { %v1363_v26 = vadd.s32 %v3078_v9, %v3101_v34  ;;  %v1453_v14 = vsel %vm1445_vm2, %v1436_v2, %v1452_v59  ;;  %v1456_v23 = vsel %vm1446_vm0, %v1442_v35, 1326507024  ;;  %vm1526_vm4 = vcmp.gt.s32.totalorder %v1525_v60, 0 }
 0x15b   :  { %vm1298_vm5 = vcmp.lt.s32.totalorder %v3144_v38, 2  ;;  %vm1805_vm6 = vcmp.lt.s32.totalorder %v1804_v11, 0  ;;  %v1450_v17 = vsel %vm1444_vm1, %v1447_v40, %v1449_v1  ;;  %v1454_v31 = vsel %vm1444_vm1, %v1451_v4, %v1453_v14 }
 0x15c   :  { %v1457_v24 = vsel %vm1445_vm2, %v1439_v19, %v1456_v23  ;;  %vm1295_vm7 = vweird.f32 %v2874_v58  ;;  %v1378_v46 = vsel %vm1805_vm6, 0, %v1804_v11  ;;  %vm1309_vm8 = vcmp.lt.s32.totalorder %v2909_v7, 0 }
 0x15d   :  { %v1458_v57 = vsel %vm1444_vm1, %v1455_v20, %v1457_v24  ;;  %v3180_v9 = vmul.u32.u64.low %v3146_v56, %v1454_v31  ;;  %v3181_v34 = vmul.u32.u64.high %v3146_v56, %v1454_v31, %v3180_v9  ;;  %v1379_v6 = vsub.s32 32, %v1378_v46 }
 0x15e   :  { %v1380_v42 = vshll.u32 %v3140_v51, %v1378_v46  ;;  %v1383_v29 = vsub.s32 4294967266, %v1378_v46  ;;  %v1527_v5 = vsel %vm1526_vm4, %v1525_v60, 0  ;;  %vm1302_vm9 = vcmp.eq.s32.totalorder %v3144_v38, 2  ;;  %v41_v38 = vld [vmem:[#allocation3 + $0x78] sm:$0xff] }
 0x15f   :  { %v3188_v44 = vmul.u32.u64.low %v3146_v56, %v1458_v57  ;;  %v3189_v52 = vmul.u32.u64.high %v3146_v56, %v1458_v57, %v3188_v44  ;;  %v1529_v47 = vand.u32 31, %v1527_v5  ;;  %v1381_v62 = vshrl.u32 %v1363_v26, %v1379_v6 }
 0x160   :  { %v1384_v50 = vadd.s32 127, %v1383_v29  ;;  %v1393_v21 = vsub.s32 4, %v3130_v16  ;;  %v1523_v3 = vor.u32 8388608, %v3150_v32  ;;  %v1466_v48 = vmul.u32 %v3146_v56, %v1450_v17 }
 0x161   :  { %v1469_v8 = vadd.s32 1, %v3181_v34  ;;  %v3195_v51 = vshrl.u32 %v1527_v5, 5  ;;  %v1530_v27 = vsub.s32 32, %v1529_v47  ;;  %vm3199_vm12 = vcmp.le.f32.partialorder %v1307_v63, 0.7853982 }
 0x162   :  { %v1935_v54 = vpop.eup %1934  ;;  %v1382_v18 = vor.u32 %v1381_v62, %v1380_v42  ;;  %v1385_v10 = vshll.u32 %v1384_v50, 23  ;;  %v1532_v2 = vshll.u32 %v2003_v37, %v1529_v47  ;;  %v1535_v32 = vshll.u32 %v2004_v39, %v1529_v47 }
 0x163   :  { %v1937_v13 = vpop.eup %1936  ;;  %v1303_v56 = vxor.u32 2147483648, %v1935_v54  ;;  %vm1468_vm10 = vc.u32 %v3189_v52, %v3180_v9  ;;  %v1538_v22 = vshll.u32 %v2005_v41, %v1529_v47  ;;  %v1541_v36 = vshll.u32 %v2006_v43, %v1529_v47 }
 0x164   :  { %v1300_v12 = vxor.u32 2147483648, %v1937_v13  ;;  %v1386_v63 = vor.u32 4788187, %v1385_v10  ;;  %v1389_v19 = vcvt.s32.f32 %v1382_v18  ;;  %v1470_v30 = vsel %vm1468_vm10, %v1469_v8, %v3181_v34 }
 0x165   :  { %v1304_v35 = vsel %vm1302_vm9, %v1303_v56, %v1937_v13  ;;  %v1471_v60 = vadd.s32 %v1470_v30, %v1466_v48  ;;  %v1533_v15 = vshrl.u32 %v2004_v39, %v1530_v27  ;;  %v1536_v40 = vshrl.u32 %v2005_v41, %v1530_v27 }
 0x166   :  { %v1301_v61 = vsel %vm1299_vm3, %v1935_v54, %v1300_v12  ;;  %v1387_v4 = vand.u32 2147483647, %v1386_v63  ;;  %v1539_v11 = vshrl.u32 %v2006_v43, %v1530_v27  ;;  %v1542_v1 = vshrl.u32 %v2007_v45, %v1530_v27 }
 0x167   :  { %v1305_v59 = vsel %vm1298_vm5, %v1301_v61, %v1304_v35  ;;  %v1394_v20 = vsel %vm1309_vm8, %v1393_v21, %v3130_v16  ;;  %v1472_v26 = vadd.s32 536870912, %v1471_v60  ;;  %v1534_v14 = vor.u32 %v1533_v15, %v1532_v2 }
 0x168   :  { %v1306_v23 = vsel %vm1295_vm7, nan, %v1305_v59  ;;  %v1390_v17 = vmul.f32 %v1389_v19, %v1387_v4  ;;  %v1537_v31 = vor.u32 %v1536_v40, %v1535_v32  ;;  %v1543_v24 = vor.u32 %v1542_v1, %v1541_v36 }
 0x169   :  { %v3225_v46 = vshrl.u32 %v1472_v26, 30  ;;  %v1544_v57 = vshll.u32 %v2007_v45, %v1529_v47  ;;  %v1545_v34 = vshrl.u32 %v2008_v53, %v1530_v27  ;;  %vm1547_vm11 = vcmp.lt.s32.totalorder %v3195_v51, 1  ;;  %1734 = vst [vmem:[#allocation6 + $0x58] sm:$0xff] %v1306_v23 }
 0x16a   :  { %v1391_v6 = vxor.u32 2147483648, %v1390_v17  ;;  %v1540_v16 = vor.u32 %v1539_v11, %v1538_v22  ;;  %vm1550_vm13 = vcmp.lt.s32.totalorder %v3195_v51, 4  ;;  %v3231_v42 = vshll.u32 %v1523_v3, 8 }
 0x16b   :  { %v1396_v58 = vsel %vm3199_vm12, 0, %v1394_v20  ;;  %v1474_v29 = vshll.u32 %v3225_v46, 30  ;;  %vm1548_vm14 = vcmp.lt.s32.totalorder %v3195_v51, 2  ;;  %vm1549_vm15 = vcmp.lt.s32.totalorder %v3195_v51, 3 }
 0x16c   :  { %v1392_v5 = vsel %vm1309_vm8, %v1391_v6, %v1390_v17  ;;  %v1546_v44 = vor.u32 %v1545_v34, %v1544_v57  ;;  %v1555_v47 = vsel %vm1547_vm11, %v1534_v14, %v1537_v31  ;;  %v1556_v62 = vsel %vm1550_vm13, %v1543_v24, 920167782 }
 0x16d   :  { %v3245_v50 = vmul.f32 %v2040_v0, %v41_v38  ;;  %v1395_v21 = vsel %vm3199_vm12, %v2909_v7, %v1392_v5  ;;  %v1475_v3 = vsub.s32 %v1471_v60, %v1474_v29  ;;  %v1531_v48 = vshrl.u32 %v2003_v37, %v1530_v27 }
 0x16e   :  { %1938 = vcosq.f32 %v1395_v21  ;;  %v1400_v8 = vadd.s32 3, %v1396_v58  ;;  %v1552_v54 = vsel %vm1550_vm13, %v1540_v16, 2102212464  ;;  %v1557_v18 = vsel %vm1549_vm15, %v1540_v16, %v1556_v62 }
 0x16f   :  { %1940 = vsinq.f32 %v1395_v21  ;;  %v1477_v10 = vsub.s32 0, %v1475_v3  ;;  %v1558_v0 = vsel %vm1548_vm14, %v1555_v47, %v1557_v18  ;;  %v1559_v49 = vsel %vm1547_vm11, %v1537_v31, %v1540_v16 }
 0x170   :  { %v1560_v2 = vsel %vm1550_vm13, %v1546_v44, 1326507024  ;;  %v3262_v27 = vmul.u32.u64.low %v3231_v42, %v1558_v0  ;;  %v3263_v32 = vmul.u32.u64.high %v3231_v42, %v1558_v0, %v3262_v27  ;;  %v1551_v56 = vsel %vm1547_vm11, %v1531_v48, %v1534_v14 }
 0x171   :  { %v1807_v13 = vmin.u32 %v1477_v10, %v1475_v3  ;;  %v1553_v22 = vsel %vm1549_vm15, %v1537_v31, %v1552_v54  ;;  %v1561_v36 = vsel %vm1549_vm15, %v1543_v24, %v1560_v2  ;;  %v1401_v12 = vand.u32 3, %v1400_v8 }
 0x172   :  { %v1562_v63 = vsel %vm1548_vm14, %v1559_v49, %v1561_v36  ;;  %v1622_v19 = vand.u32 2139095040, %v3245_v50  ;;  %v1554_v35 = vsel %vm1548_vm14, %v1551_v56, %v1553_v22  ;;  %vm1399_vm0 = vweird.f32 %v2909_v7 }
 0x173   :  { %v1479_v30 = vclz %v1807_v13  ;;  %v3278_v60 = vmul.u32.u64.low %v3231_v42, %v1562_v63  ;;  %v3279_v15 = vmul.u32.u64.high %v3231_v42, %v1562_v63, %v3278_v60  ;;  %vm1403_vm1 = vcmp.eq.s32.totalorder %v1401_v12, 0 }
 0x174   :  { %v1623_v40 = vshrl.u32 %v1622_v19, 23  ;;  %vm1413_vm2 = vcmp.lt.s32.totalorder %v3058_v25, 0  ;;  %v1573_v4 = vadd.s32 1, %v3263_v32  ;;  %vm1406_vm3 = vcmp.eq.s32.totalorder %v1401_v12, 2 }
 0x175   :  { %v1808_v61 = vadd.s32 4294967294, %v1479_v30  ;;  %v1467_v1 = vadd.s32 %v3180_v9, %v3189_v52  ;;  %v1570_v51 = vmul.u32 %v3231_v42, %v1554_v35  ;;  %v1497_v26 = vsub.s32 4, %v3225_v46 }
 0x176   :  { %v1814_v11 = vadd.s32 4294967169, %v1623_v40  ;;  %vm1572_vm5 = vc.u32 %v3279_v15, %v3262_v27  ;;  %vm1402_vm6 = vcmp.lt.s32.totalorder %v1401_v12, 2  ;;  %v1619_v29 = vand.u32 2147483647, %v3245_v50 }
 0x177   :  { %vm1809_vm4 = vcmp.lt.s32.totalorder %v1808_v61, 0  ;;  %v1574_v9 = vsel %vm1572_vm5, %v1573_v4, %v3263_v32  ;;  %v1498_v58 = vsel %vm1413_vm2, %v1497_v26, %v3225_v46  ;;  %vm3301_vm8 = vcmp.le.f32.partialorder %v1411_v28, 0.7853982 }
 0x178   :  { %v1939_v59 = vpop.eup %1938  ;;  %v1482_v20 = vsel %vm1809_vm4, 0, %v1808_v61  ;;  %v1629_v14 = vadd.s32 1, %v1814_v11  ;;  %v1575_v16 = vadd.s32 %v1574_v9, %v1570_v51  ;;  %v1500_v10 = vsel %vm3301_vm8, 0, %v1498_v58 }
 0x179   :  { %v1941_v23 = vpop.eup %1940  ;;  %v1407_v17 = vxor.u32 2147483648, %v1939_v59  ;;  %v1483_v31 = vsub.s32 32, %v1482_v20  ;;  %v1484_v24 = vshll.u32 %v1475_v3, %v1482_v20  ;;  %v1487_v57 = vsub.s32 4294967266, %v1482_v20 }
 0x17a   :  { %v1404_v34 = vxor.u32 2147483648, %v1941_v23  ;;  %vm1630_vm7 = vcmp.gt.s32.totalorder %v1629_v14, 0  ;;  %v1576_v21 = vadd.s32 536870912, %v1575_v16  ;;  %v1626_v0 = vand.u32 8388607, %v1619_v29 }
 0x17b   :  { %v1408_v52 = vsel %vm1406_vm3, %v1407_v17, %v1941_v23  ;;  %v1485_v38 = vshrl.u32 %v1467_v1, %v1483_v31  ;;  %v1488_v6 = vadd.s32 127, %v1487_v57  ;;  %v1631_v5 = vsel %vm1630_vm7, %v1629_v14, 0 }
 0x17c   :  { %v1405_v42 = vsel %vm1403_vm1, %v1939_v59, %v1404_v34  ;;  %v1633_v48 = vand.u32 31, %v1631_v5  ;;  %v3305_v46 = vshrl.u32 %v1576_v21, 30  ;;  %v1632_v7 = vshrl.u32 %v1631_v5, 5 }
 0x17d   :  { %v1409_v44 = vsel %vm1402_vm6, %v1405_v42, %v1408_v52  ;;  %v1486_v47 = vor.u32 %v1485_v38, %v1484_v24  ;;  %v1489_v62 = vshll.u32 %v1488_v6, 23  ;;  %v1504_v60 = vadd.s32 3, %v1500_v10 }
 0x17e   :  { %v1410_v3 = vsel %vm1399_vm0, nan, %v1409_v44  ;;  %v1634_v49 = vsub.s32 32, %v1633_v48  ;;  %v1578_v32 = vshll.u32 %v3305_v46, 30  ;;  %v1636_v28 = vshll.u32 %v2003_v37, %v1633_v48 }
 0x17f   :  { %v1490_v54 = vor.u32 4788187, %v1489_v62  ;;  %v1493_v18 = vcvt.s32.f32 %v1486_v47  ;;  %1735 = vst [vmem:[#allocation6 + $0x60] sm:$0xff] %v1410_v3  ;;  %v1639_v13 = vshll.u32 %v2004_v39, %v1633_v48  ;;  %v1642_v36 = vshll.u32 %v2005_v41, %v1633_v48 }
 0x180   :  { %v1637_v56 = vshrl.u32 %v2004_v39, %v1634_v49  ;;  %v1640_v22 = vshrl.u32 %v2005_v41, %v1634_v49  ;;  %v1643_v12 = vshrl.u32 %v2006_v43, %v1634_v49  ;;  %v1579_v19 = vsub.s32 %v1575_v16, %v1578_v32 }
 0x181   :  { %v1491_v2 = vand.u32 2147483647, %v1490_v54  ;;  %v1645_v30 = vshll.u32 %v2006_v43, %v1633_v48  ;;  %v1646_v35 = vshrl.u32 %v2007_v45, %v1634_v49  ;;  %v1627_v4 = vor.u32 8388608, %v1626_v0 }
 0x182   :  { %v1581_v61 = vsub.s32 0, %v1579_v19  ;;  %v1638_v11 = vor.u32 %v1637_v56, %v1636_v28  ;;  %v1641_v1 = vor.u32 %v1640_v22, %v1639_v13  ;;  %v1644_v51 = vor.u32 %v1643_v12, %v1642_v36 }
 0x183   :  { %v1494_v63 = vmul.f32 %v1493_v18, %v1491_v2  ;;  %v1648_v39 = vshll.u32 %v2007_v45, %v1633_v48  ;;  %v1649_v59 = vshrl.u32 %v2008_v53, %v1634_v49  ;;  %v1647_v26 = vor.u32 %v1646_v35, %v1645_v30 }
 0x184   :  { %v1811_v20 = vmin.u32 %v1581_v61, %v1579_v19  ;;  %vm1651_vm9 = vcmp.lt.s32.totalorder %v1632_v7, 1  ;;  %v1635_v14 = vshrl.u32 %v2003_v37, %v1634_v49  ;;  %vm1654_vm12 = vcmp.lt.s32.totalorder %v1632_v7, 4 }
 0x185   :  { %v1495_v40 = vxor.u32 2147483648, %v1494_v63  ;;  %v1650_v23 = vor.u32 %v1649_v59, %v1648_v39  ;;  %vm1653_vm10 = vcmp.lt.s32.totalorder %v1632_v7, 3  ;;  %v1667_v45 = vshll.u32 %v1627_v4, 8 }
 0x186   :  { %v1583_v17 = vclz %v1811_v20  ;;  %vm1652_vm11 = vcmp.lt.s32.totalorder %v1632_v7, 2  ;;  %v1656_v53 = vsel %vm1654_vm12, %v1644_v51, 2102212464  ;;  %v1659_v31 = vsel %vm1651_vm9, %v1638_v11, %v1641_v1 }
 0x187   :  { %v1496_v41 = vsel %vm1413_vm2, %v1495_v40, %v1494_v63  ;;  %v1505_v24 = vand.u32 3, %v1504_v60  ;;  %v1660_v34 = vsel %vm1654_vm12, %v1647_v26, 920167782  ;;  %v1663_v9 = vsel %vm1651_vm9, %v1641_v1, %v1644_v51 }
 0x188   :  { %v1499_v43 = vsel %vm3301_vm8, %v3058_v25, %v1496_v41  ;;  %v1812_v57 = vadd.s32 4294967294, %v1583_v17  ;;  %v1655_v37 = vsel %vm1651_vm9, %v1635_v14, %v1638_v11  ;;  %v1657_v52 = vsel %vm1653_vm10, %v1641_v1, %v1656_v53 }
 0x189   :  { %1942 = vcosq.f32 %v1499_v43  ;;  %v1661_v38 = vsel %vm1653_vm10, %v1644_v51, %v1660_v34  ;;  %v1664_v6 = vsel %vm1654_vm12, %v1650_v23, 1326507024  ;;  %v1571_v16 = vadd.s32 %v3262_v27, %v3279_v15 }
 0x18a   :  { %1944 = vsinq.f32 %v1499_v43  ;;  %vm1813_vm13 = vcmp.lt.s32.totalorder %v1812_v57, 0  ;;  %v1662_v42 = vsel %vm1652_vm11, %v1659_v31, %v1661_v38  ;;  %v1665_v58 = vsel %vm1653_vm10, %v1647_v26, %v1664_v6 }
 0x18b   :  { %v1586_v5 = vsel %vm1813_vm13, 0, %v1812_v57  ;;  %v1666_v44 = vsel %vm1652_vm11, %v1663_v9, %v1665_v58  ;;  %v3341_v47 = vmul.u32.u64.low %v1667_v45, %v1662_v42  ;;  %v3342_v62 = vmul.u32.u64.high %v1667_v45, %v1662_v42, %v3341_v47 }
 0x18c   :  { %v1587_v21 = vsub.s32 32, %v1586_v5  ;;  %v1588_v3 = vshll.u32 %v1579_v19, %v1586_v5  ;;  %v1591_v48 = vsub.s32 4294967266, %v1586_v5  ;;  %v1658_v8 = vsel %vm1652_vm11, %v1655_v37, %v1657_v52 }
 0x18d   :  { %v3345_v54 = vmul.u32.u64.low %v1667_v45, %v1666_v44  ;;  %v3346_v18 = vmul.u32.u64.high %v1667_v45, %v1666_v44, %v3345_v54  ;;  %v1674_v10 = vmul.u32 %v1667_v45, %v1658_v8  ;;  %v1677_v0 = vadd.s32 1, %v3342_v62 }
 0x18e   :  { %v1589_v27 = vshrl.u32 %v1571_v16, %v1587_v21  ;;  %v1592_v15 = vadd.s32 127, %v1591_v48  ;;  %vm1510_vm14 = vcmp.eq.s32.totalorder %v1505_v24, 2  ;;  %vm1506_vm15 = vcmp.lt.s32.totalorder %v1505_v24, 2 }
 0x18f   :  { %vm1507_vm0 = vcmp.eq.s32.totalorder %v1505_v24, 0  ;;  %vm1676_vm1 = vc.u32 %v3346_v18, %v3341_v47  ;;  %vm1503_vm2 = vweird.f32 %v3058_v25  ;;  %v1601_v35 = vsub.s32 4, %v3305_v46 }
 0x190   :  { %v1590_v2 = vor.u32 %v1589_v27, %v1588_v3  ;;  %v1593_v32 = vshll.u32 %v1592_v15, 23  ;;  %v1678_v36 = vsel %vm1676_vm1, %v1677_v0, %v3342_v62  ;;  %vm1517_vm3 = vcmp.lt.s32.totalorder %v3093_v33, 0 }
 0x191   :  { %v1679_v63 = vadd.s32 %v1678_v36, %v1674_v10  ;;  %vm1516_vm4 = vcmp.le.f32.partialorder %v1515_v55, 0.7853982  ;;  %v1602_v25 = vsel %vm1517_vm3, %v1601_v35, %v3305_v46  ;;  %v1675_v53 = vadd.s32 %v3341_v47, %v3346_v18 }
 0x192   :  { %v1594_v56 = vor.u32 4788187, %v1593_v32  ;;  %v1597_v22 = vcvt.s32.f32 %v1590_v2  ;;  %v1604_v41 = vsel %vm1516_vm4, 0, %v1602_v25  ;;  %vm1607_vm9 = vweird.f32 %v3093_v33 }
 0x193   :  { %v1943_v49 = vpop.eup %1942  ;;  %v1680_v40 = vadd.s32 536870912, %v1679_v63  ;;  %v1608_v43 = vadd.s32 3, %v1604_v41  ;;  %vm1621_vm12 = vcmp.lt.s32.totalorder %v3245_v50, 0  ;;  %vm1620_vm10 = vcmp.le.f32.partialorder %v1619_v29, 0.7853982 }
 0x194   :  { %v1945_v28 = vpop.eup %1944  ;;  %v1511_v13 = vxor.u32 2147483648, %v1943_v49  ;;  %v1595_v30 = vand.u32 2147483647, %v1594_v56 }
 0x195   :  { %v1508_v7 = vxor.u32 2147483648, %v1945_v28  ;;  %v1681_v11 = vshrl.u32 %v1680_v40, 30  ;;  %v1609_v17 = vand.u32 3, %v1608_v43 }
 0x196   :  { %v1512_v12 = vsel %vm1510_vm14, %v1511_v13, %v1945_v28  ;;  %v1598_v4 = vmul.f32 %v1597_v22, %v1595_v30 }
 0x197   :  { %v1509_v19 = vsel %vm1507_vm0, %v1943_v49, %v1508_v7  ;;  %v1682_v51 = vshll.u32 %v1681_v11, 30  ;;  %vm1611_vm6 = vcmp.eq.s32.totalorder %v1609_v17, 0  ;;  %vm1614_vm7 = vcmp.eq.s32.totalorder %v1609_v17, 2 }
 0x198   :  { %v1513_v60 = vsel %vm1506_vm15, %v1509_v19, %v1512_v12  ;;  %v1599_v1 = vxor.u32 2147483648, %v1598_v4  ;;  %vm1610_vm8 = vcmp.lt.s32.totalorder %v1609_v17, 2  ;;  %v1705_v3 = vsub.s32 4, %v1681_v11 }
 0x199   :  { %v1514_v61 = vsel %vm1503_vm2, nan, %v1513_v60  ;;  %v1683_v20 = vsub.s32 %v1679_v63, %v1682_v51  ;;  %vm1711_vm15 = vweird.f32 %v3245_v50 }
 0x19a   :  { %1736 = vst [vmem:[#allocation6 + $0x68] sm:$0xff] %v1514_v61  ;;  %v1600_v39 = vsel %vm1517_vm3, %v1599_v1, %v1598_v4  ;;  %v1706_v8 = vsel %vm1621_vm12, %v1705_v3, %v1681_v11 }
 0x19b   :  { %v1603_v59 = vsel %vm1516_vm4, %v3093_v33, %v1600_v39  ;;  %v1685_v26 = vsub.s32 0, %v1683_v20  ;;  %v1708_v27 = vsel %vm1620_vm10, 0, %v1706_v8 }
 0x19c   :  { %1946 = vcosq.f32 %v1603_v59  ;;  %v1712_v15 = vadd.s32 3, %v1708_v27 }
 0x19d   :  { %1948 = vsinq.f32 %v1603_v59  ;;  %v1815_v14 = vmin.u32 %v1685_v26, %v1683_v20 }
 0x19e   :  { %v1713_v10 = vand.u32 3, %v1712_v15 }
 0x19f   :  { %v1687_v23 = vclz %v1815_v14 }
 0x1a0   :  { %vm1718_vm11 = vcmp.eq.s32.totalorder %v1713_v10, 2  ;;  %vm1715_vm13 = vcmp.eq.s32.totalorder %v1713_v10, 0  ;;  %vm1714_vm14 = vcmp.lt.s32.totalorder %v1713_v10, 2 }
 0x1a1   :  { %v1816_v45 = vadd.s32 4294967294, %v1687_v23 }
 0x1a3   :  { %vm1817_vm5 = vcmp.lt.s32.totalorder %v1816_v45, 0 }
 0x1a4   :  { %v1690_v46 = vsel %vm1817_vm5, 0, %v1816_v45 }
 0x1a5   :  { %v1691_v57 = vsub.s32 32, %v1690_v46  ;;  %v1692_v34 = vshll.u32 %v1683_v20, %v1690_v46  ;;  %v1695_v9 = vsub.s32 4294967266, %v1690_v46 }
 0x1a6   :  { %v1947_v55 = vpop.eup %1946 }
 0x1a7   :  { %v1949_v31 = vpop.eup %1948  ;;  %v1615_v24 = vxor.u32 2147483648, %v1947_v55  ;;  %v1693_v38 = vshrl.u32 %v1675_v53, %v1691_v57  ;;  %v1696_v6 = vadd.s32 127, %v1695_v9 }
 0x1a8   :  { %v1612_v37 = vxor.u32 2147483648, %v1949_v31 }
 0x1a9   :  { %v1616_v52 = vsel %vm1614_vm7, %v1615_v24, %v1949_v31  ;;  %v1694_v58 = vor.u32 %v1693_v38, %v1692_v34  ;;  %v1697_v5 = vshll.u32 %v1696_v6, 23 }
 0x1aa   :  { %v1613_v16 = vsel %vm1611_vm6, %v1947_v55, %v1612_v37 }
 0x1ab   :  { %v1617_v42 = vsel %vm1610_vm8, %v1613_v16, %v1616_v52  ;;  %v1698_v47 = vor.u32 4788187, %v1697_v5  ;;  %v1701_v62 = vcvt.s32.f32 %v1694_v58 }
 0x1ac   :  { %v1618_v44 = vsel %vm1607_vm9, nan, %v1617_v42 }
 0x1ad   :  { %1737 = vst [vmem:[#allocation6 + $0x70] sm:$0xff] %v1618_v44  ;;  %v1699_v21 = vand.u32 2147483647, %v1698_v47 }
 0x1af   :  { %v1702_v48 = vmul.f32 %v1701_v62, %v1699_v21 }
 0x1b1   :  { %v1703_v33 = vxor.u32 2147483648, %v1702_v48 }
 0x1b3   :  { %v1704_v54 = vsel %vm1621_vm12, %v1703_v33, %v1702_v48 }
 0x1b4   :  { %v1707_v18 = vsel %vm1620_vm10, %v3245_v50, %v1704_v54 }
 0x1b5   :  { %1950 = vcosq.f32 %v1707_v18 }
 0x1b6   :  { %1952 = vsinq.f32 %v1707_v18 }
 0x1bf   :  { %v1951_v0 = vpop.eup %1950 }
 0x1c0   :  { %v1953_v49 = vpop.eup %1952  ;;  %v1719_v2 = vxor.u32 2147483648, %v1951_v0 }
 0x1c1   :  { %v1716_v32 = vxor.u32 2147483648, %v1953_v49 }
 0x1c2   :  { %v1720_v29 = vsel %vm1718_vm11, %v1719_v2, %v1953_v49 }
 0x1c3   :  { %v1717_v28 = vsel %vm1715_vm13, %v1951_v0, %v1716_v32 }
 0x1c4   :  { %v1721_v13 = vsel %vm1714_vm14, %v1717_v28, %v1720_v29 }
 0x1c5   :  { %v1722_v7 = vsel %vm1711_vm15, nan, %v1721_v13 }
 0x1c6   :  { %1738 = vst [vmem:[#allocation6 + $0x78] sm:$0xff] %v1722_v7 }
 0x1c7   :  { %1987 = shalt.err (!%p1984_p12)
}
 0x1c8   :  { %s1988_s26 = scalar_lea.hbm %s3379_s2, 2048 }
 0x1c9   :  { %p1989_p13 = scmp.ne.s32.totalorder %s3379_s2, %s1988_s26  ;;  %p1992_p0 = scmp.lt.u32.totalorder %s1988_s26, %s3379_s2 }
 0x1cb   :  { %p1994_p1 = pnand %p1992_p0, %p1989_p13 }
 0x1cd   :  { %1997 = shalt.err (!%p1994_p1)
}
 0x1ce   :  { %1748 = dma.vmem_to_hbm [thread:$0]  %s1746_s1, 2048, %s3379_s2, [#allocation5]  }
 0x1cf   :  { %2000 = dma.done.wait [#allocation5], 2048  }
 0x1d0   :  { %2001 = vsyncadd [#allocation5], 4294965248 }
 0x1d1   :  { %1752 = vsyncpa [#allocation4], 1 }
 0x1d2   :  { %1753 = vsyncpa [#allocation5], 1 }

</bundles_post_ra>
